<compile_context>
chip_gen: v7x
topology: tpu7x:2x2x1
jax: 0.10.0
libtpu: 0.0.40
codegen_flags: <defaults>
</compile_context>

<pallas_src>
import functools

import jax
import jax.numpy as jnp
from jax.experimental import pallas as pl
from jax.experimental.pallas import tpu as pltpu


# ---------------------------------------------------------------------------
# Kernels
# ---------------------------------------------------------------------------

def _ffn_kernel_single(x_ref, w1_ref, b1_ref, w2_ref, b2_ref, o_ref):
    """Single-pass FFN tile: both weight matrices resident in VMEM.

    x_ref : (tm, C)  input rows (original dtype, cast to bf16 in-kernel)
    w1_ref: (C, H)   bf16
    b1_ref: (1, H)   f32
    w2_ref: (H, C)   bf16
    b2_ref: (1, C)   f32
    o_ref : (tm, C)  output rows
    """
    x = x_ref[...].astype(jnp.bfloat16)             # cheap VPU cast, hidden under MXU
    h = jnp.dot(x, w1_ref[...], preferred_element_type=jnp.float32)
    h = jnp.maximum(h + b1_ref[...], 0.0)           # bias + ReLU in f32
    out = jnp.dot(h.astype(jnp.bfloat16), w2_ref[...],
                  preferred_element_type=jnp.float32)
    o_ref[...] = (out + b2_ref[...]).astype(o_ref.dtype)


def _ffn_kernel_acc(x_ref, w1_ref, b1_ref, w2_ref, b2_ref, o_ref, acc_ref):
    """H-streamed FFN tile: hidden dim is the innermost reduction grid axis."""
    kh = pl.program_id(1)

    @pl.when(kh == 0)
    def _():
        # Fold the second bias into the accumulator init (saves one VPU pass).
        acc_ref[...] = jnp.broadcast_to(b2_ref[...], acc_ref.shape)

    x = x_ref[...].astype(jnp.bfloat16)
    h = jnp.dot(x, w1_ref[...], preferred_element_type=jnp.float32)
    h = jnp.maximum(h + b1_ref[...], 0.0)
    acc_ref[...] += jnp.dot(h.astype(jnp.bfloat16), w2_ref[...],
                            preferred_element_type=jnp.float32)

    @pl.when(kh == pl.num_programs(1) - 1)
    def _():
        o_ref[...] = acc_ref[...].astype(o_ref.dtype)


# ---------------------------------------------------------------------------
# Tile planning (Python level, outside jit)
# ---------------------------------------------------------------------------

def _round_up(n, m):
    return ((n + m - 1) // m) * m


def _tpu_generation():
    """Best-effort (physical VMEM bytes, multi-TC flag, kind) with safe fallbacks."""
    kind = ""
    try:
        kind = (jax.devices()[0].device_kind or "").lower()
    except Exception:
        pass
    vmem = None
    try:
        vmem = int(pltpu.get_tpu_info().vmem_capacity_bytes)
    except Exception:
        vmem = None
    if vmem is None:
        # v7x halves VMEM to 64 MiB; be conservative when unsure.
        vmem = 64 * 1024 * 1024 if ("7" in kind) else 128 * 1024 * 1024
    multi_tc = any(t in kind for t in ("7x", "v7", "v5p", "v4", "v3", "v2"))
    return vmem, multi_tc, kind


def _plan(M, C, H, x_itemsize, out_itemsize):
    """Pick (tm, th, single_pass, vmem_limit) per generation and VMEM budget."""
    vmem_phys, multi_tc, kind = _tpu_generation()
    # Scoped VMEM budget: ~3/4 of physical, capped (~48 MiB v7x, ~96 MiB v5e/v6e).
    vmem_budget = min((vmem_phys * 3) // 4, 96 * 1024 * 1024)

    # Per-generation defaults (weight re-streaming roofline on the fallback path).
    if "v6" in kind:
        tm_default, th_cap = 768, 1024
    elif ("v5" in kind) and ("v5p" not in kind):      # v5e / v5 lite
        tm_default, th_cap = 256, 512
    else:                                             # v7x / v5p / unknown
        tm_default, th_cap = 512, 512

    tm = min(tm_default, _round_up(M, 16))

    # Multi-TensorCore chips (v7x etc.): ensure the "parallel" row axis has >=2 blocks.
    if multi_tc and M > 16 and pl.cdiv(M, tm) < 2:
        tm = max(16, _round_up(pl.cdiv(M, 2), 16))

    def footprint(tm_, th_, with_acc):
        w = 2 * (C * th_ * 2 + th_ * C * 2)          # double-buffered bf16 W1 + W2 tiles
        xb = 2 * tm_ * C * x_itemsize                # double-buffered activation tile
        ob = 2 * tm_ * C * out_itemsize              # double-buffered output tile
        bias = 2 * (th_ * 4 + C * 4)
        inter = tm_ * th_ * 4 + tm_ * C * 4          # f32 hidden intermediate + out temp
        acc = tm_ * C * 4 if with_acc else 0
        return w + xb + ob + bias + inter + acc

    # Preferred path: single pass with the whole hidden dim resident (no kh axis).
    tm_sp = tm
    while tm_sp > 16 and footprint(tm_sp, H, False) > vmem_budget:
        tm_sp = max(16, _round_up(tm_sp // 2, 16))
    if footprint(tm_sp, H, False) <= vmem_budget:
        return tm_sp, H, True, int(vmem_budget)

    # Fallback: stream H in the largest 128-multiple tile that divides H.
    th = H
    if H % 128 == 0:
        cap = max(128, min(th_cap, H))
        cap = (cap // 128) * 128
        th = 128                                      # guaranteed divisor
        t = cap
        while t >= 128:
            if H % t == 0:
                th = t
                break
            t -= 128
    # TODO(synk): H not a multiple of 128 falls back to full-H weight blocks.
    tm_st = tm
    while tm_st > 16 and footprint(tm_st, th, True) > vmem_budget:
        tm_st = max(16, _round_up(tm_st // 2, 16))
    return tm_st, th, False, int(vmem_budget)


# ---------------------------------------------------------------------------
# pallas_call wrappers
# ---------------------------------------------------------------------------

@functools.partial(jax.jit,
                   static_argnames=("tm", "th", "single_pass", "vmem_limit"))
def _feed_forward_impl(x, w1, b1, w2, b2, *, tm, th, single_pass, vmem_limit):
    B, T, C = x.shape
    H = w1.shape[1]
    M = B * T
    out_dtype = x.dtype

    x2 = x.reshape(M, C)                       # leading-dim merge: no copy
    w1b = w1.astype(jnp.bfloat16)
    w2b = w2.astype(jnp.bfloat16)
    b1_2 = b1.reshape(1, H).astype(jnp.float32)
    b2_2 = b2.reshape(1, C).astype(jnp.float32)

    n_row = pl.cdiv(M, tm)                     # ragged last block handled by Pallas masking
    out_bytes = jnp.dtype(out_dtype).itemsize
    flops = 4 * n_row * tm * C * H

    if single_pass:
        bytes_accessed = (M * C * x2.dtype.itemsize
                          + (w1b.size + w2b.size) * 2          # weights fetched once
                          + b1_2.size * 4 + b2_2.size * 4
                          + M * C * out_bytes)
        out = pl.pallas_call(
            _ffn_kernel_single,
            out_shape=jax.ShapeDtypeStruct((M, C), out_dtype),
            grid_spec=pltpu.PrefetchScalarGridSpec(
                num_scalar_prefetch=0,
                grid=(n_row,),
                in_specs=[
                    pl.BlockSpec((tm, C), lambda i: (i, 0)),    # x rows
                    pl.BlockSpec((C, H), lambda i: (0, 0)),     # W1 (resident)
                    pl.BlockSpec((1, H), lambda i: (0, 0)),     # b1
                    pl.BlockSpec((H, C), lambda i: (0, 0)),     # W2 (resident)
                    pl.BlockSpec((1, C), lambda i: (0, 0)),     # b2
                ],
                out_specs=pl.BlockSpec((tm, C), lambda i: (i, 0)),
            ),
            compiler_params=pltpu.CompilerParams(
                dimension_semantics=("parallel",),
                vmem_limit_bytes=vmem_limit),
            cost_estimate=pl.CostEstimate(
                flops=flops, transcendentals=0, bytes_accessed=bytes_accessed),
        )(x2, w1b, b1_2, w2b, b2_2)
    else:
        n_kh = H // th
        bytes_accessed = (M * C * x2.dtype.itemsize
                          + (w1b.size + w2b.size) * 2 * n_row   # re-streamed per row tile
                          + (b1_2.size * 4 + b2_2.size * 4) * n_row
                          + M * C * out_bytes)
        out = pl.pallas_call(
            _ffn_kernel_acc,
            out_shape=jax.ShapeDtypeStruct((M, C), out_dtype),
            grid_spec=pltpu.PrefetchScalarGridSpec(
                num_scalar_prefetch=0,
                grid=(n_row, n_kh),
                in_specs=[
                    pl.BlockSpec((tm, C), lambda i, kh: (i, 0)),   # x rows
                    pl.BlockSpec((C, th), lambda i, kh: (0, kh)),  # W1 cols
                    pl.BlockSpec((1, th), lambda i, kh: (0, kh)),  # b1
                    pl.BlockSpec((th, C), lambda i, kh: (kh, 0)),  # W2 rows
                    pl.BlockSpec((1, C), lambda i, kh: (0, 0)),    # b2
                ],
                out_specs=pl.BlockSpec((tm, C), lambda i, kh: (i, 0)),
                scratch_shapes=[pltpu.VMEM((tm, C), jnp.float32)],
            ),
            compiler_params=pltpu.CompilerParams(
                dimension_semantics=("parallel", "arbitrary"),
                vmem_limit_bytes=vmem_limit),
            cost_estimate=pl.CostEstimate(
                flops=flops, transcendentals=0, bytes_accessed=bytes_accessed),
        )(x2, w1b, b1_2, w2b, b2_2)

    return out.reshape(B, T, C)


def feed_forward(x, w1, b1, w2, b2):
    """x: [B, T, C] -> [B, T, C]. Fused Linear->ReLU->Linear (dropout = eval)."""
    B, T, C = x.shape
    H = w1.shape[1]
    M = B * T
    itemsize = jnp.dtype(x.dtype).itemsize
    tm, th, single_pass, vmem_limit = _plan(M, C, H, itemsize, itemsize)
    return _feed_forward_impl(x, w1, b1, w2, b2, tm=tm, th=th,
                              single_pass=single_pass, vmem_limit=vmem_limit)


# ---------------------------------------------------------------------------
# Test harness
# ---------------------------------------------------------------------------

def _init_params(key, n_embed):
    """Deterministic init mimicking nn.Linear defaults (uniform(-1/sqrt(fan_in)))."""
    hidden = 4 * n_embed
    k1, k2, k3, k4 = jax.random.split(key, 4)
    lim1 = 1.0 / (n_embed ** 0.5)
    lim2 = 1.0 / (hidden ** 0.5)
    w1 = jax.random.uniform(k1, (n_embed, hidden), jnp.float32, -lim1, lim1)
    b1 = jax.random.uniform(k2, (hidden,), jnp.float32, -lim1, lim1)
    w2 = jax.random.uniform(k3, (hidden, n_embed), jnp.float32, -lim2, lim2)
    b2 = jax.random.uniform(k4, (n_embed,), jnp.float32, -lim2, lim2)
    return w1, b1, w2, b2


if __name__ == "__main__":
    # Shapes consistent with the module: batch=2, seq=8, n_embed=384 (spec value).
    B, T, n_embed = 2, 8, 384
    dropout = 0.0  # inference-mode (Dropout == identity)

    key = jax.random.PRNGKey(0)
    kx, kp = jax.random.split(key)
    x = jax.random.normal(kx, (B, T, n_embed), jnp.float32)
    w1, b1, w2, b2 = _init_params(kp, n_embed)

    out = feed_forward(x, w1, b1, w2, b2)
    out = jax.block_until_ready(out)
    assert out.shape == (B, T, n_embed)

    # Reference 1: bf16-matched (same dtype handling as kernel) — tight check.
    x2 = x.reshape(-1, n_embed)
    hb = jnp.dot(x2.astype(jnp.bfloat16), w1.astype(jnp.bfloat16),
                 preferred_element_type=jnp.float32) + b1
    hb = jnp.maximum(hb, 0.0)
    ref_bf16 = jnp.dot(hb.astype(jnp.bfloat16), w2.astype(jnp.bfloat16),
                       preferred_element_type=jnp.float32) + b2
    ref_bf16 = ref_bf16.reshape(B, T, n_embed)
    assert jnp.allclose(out, ref_bf16, atol=2e-3, rtol=2e-3)

    # Reference 2: full f32 — loose semantic check (bf16 MXU rounding).
    ref_f32 = (jnp.maximum(x2 @ w1 + b1, 0.0) @ w2 + b2).reshape(B, T, n_embed)
    assert jnp.allclose(out, ref_f32, atol=1e-1, rtol=1e-1)

    print("KERNEL_OK")
</pallas_src>

<mosaic_0001>
module attributes {stable_mosaic.version = 11 : i64} {
  func.func @_ffn_kernel_single(%arg0: i32, %arg1: memref<16x384xf32, #tpu.memory_space<vmem>>, %arg2: memref<384x1536xbf16, #tpu.memory_space<vmem>>, %arg3: memref<1x1536xf32, #tpu.memory_space<vmem>>, %arg4: memref<1536x384xbf16, #tpu.memory_space<vmem>>, %arg5: memref<1x384xf32, #tpu.memory_space<vmem>>, %arg6: memref<16x384xf32, #tpu.memory_space<vmem>>) attributes {dimension_semantics = [#tpu.dimension_semantics<parallel>], iteration_bounds = array<i64: 1>, scalar_prefetch = 0 : i64, scratch_operands = 0 : i64, tpu.core_type = #tpu.core_type<tc>, window_params = [{transform_indices = @transform_0, window_bounds = array<i64: 16, 384>}, {pipeline_mode = #tpu.pipeline_mode<synchronous>, transform_indices = @transform_1, window_bounds = array<i64: 384, 1536>}, {pipeline_mode = #tpu.pipeline_mode<synchronous>, transform_indices = @transform_2, window_bounds = array<i64: 1, 1536>}, {pipeline_mode = #tpu.pipeline_mode<synchronous>, transform_indices = @transform_3, window_bounds = array<i64: 1536, 384>}, {pipeline_mode = #tpu.pipeline_mode<synchronous>, transform_indices = @transform_4, window_bounds = array<i64: 1, 384>}, {transform_indices = @transform_5, window_bounds = array<i64: 16, 384>}]} {
    %c0 = arith.constant 0 : index
    %c0_0 = arith.constant 0 : index
    %0 = vector.load %arg1[%c0, %c0_0] : memref<16x384xf32, #tpu.memory_space<vmem>>, vector<16x384xf32>
    %1 = arith.truncf %0 : vector<16x384xf32> to vector<16x384xbf16>
    %c0_1 = arith.constant 0 : index
    %c0_2 = arith.constant 0 : index
    %2 = vector.load %arg2[%c0_1, %c0_2] : memref<384x1536xbf16, #tpu.memory_space<vmem>>, vector<384x1536xbf16>
    %cst = arith.constant dense<0.000000e+00> : vector<16x1536xf32>
    %3 = tpu.matmul %1, %2, %cst {dimension_numbers = #tpu.dot_dimension_numbers<[1], [0], [0], [1], [0, 0, 1, 1], [], []>} : vector<16x384xbf16>, vector<384x1536xbf16>, vector<16x1536xf32> -> vector<16x1536xf32>
    %c0_3 = arith.constant 0 : index
    %c0_4 = arith.constant 0 : index
    %4 = vector.load %arg3[%c0_3, %c0_4] : memref<1x1536xf32, #tpu.memory_space<vmem>>, vector<1x1536xf32>
    %5 = vector.broadcast %4 : vector<1x1536xf32> to vector<16x1536xf32>
    %6 = arith.addf %3, %5 : vector<16x1536xf32>
    %cst_5 = arith.constant 0.000000e+00 : f32
    %7 = vector.broadcast %cst_5 : f32 to vector<16x1536xf32>
    %8 = arith.maximumf %6, %7 : vector<16x1536xf32>
    %9 = arith.truncf %8 : vector<16x1536xf32> to vector<16x1536xbf16>
    %c0_6 = arith.constant 0 : index
    %c0_7 = arith.constant 0 : index
    %10 = vector.load %arg4[%c0_6, %c0_7] : memref<1536x384xbf16, #tpu.memory_space<vmem>>, vector<1536x384xbf16>
    %cst_8 = arith.constant dense<0.000000e+00> : vector<16x384xf32>
    %11 = tpu.matmul %9, %10, %cst_8 {dimension_numbers = #tpu.dot_dimension_numbers<[1], [0], [0], [1], [0, 0, 1, 1], [], []>} : vector<16x1536xbf16>, vector<1536x384xbf16>, vector<16x384xf32> -> vector<16x384xf32>
    %c0_9 = arith.constant 0 : index
    %c0_10 = arith.constant 0 : index
    %12 = vector.load %arg5[%c0_9, %c0_10] : memref<1x384xf32, #tpu.memory_space<vmem>>, vector<1x384xf32>
    %13 = vector.broadcast %12 : vector<1x384xf32> to vector<16x384xf32>
    %14 = arith.addf %11, %13 : vector<16x384xf32>
    %c0_11 = arith.constant 0 : index
    %c0_12 = arith.constant 0 : index
    %15 = vector.load %arg6[%c0_11, %c0_12] : memref<16x384xf32, #tpu.memory_space<vmem>>, vector<16x384xf32>
    tpu.vector_store %arg6[%c0_11, %c0_12], %14 {strides = array<i32>} : memref<16x384xf32, #tpu.memory_space<vmem>>, vector<16x384xf32>,
    return
  }
  func.func @transform_0(%arg0: i32) -> (i32, i32) {
    %c0_i32 = arith.constant 0 : i32
    %c0_i32_0 = arith.constant 0 : i32
    return %arg0, %c0_i32 : i32, i32
  }
  func.func @transform_1(%arg0: i32) -> (i32, i32) {
    %c0_i32 = arith.constant 0 : i32
    %c0_i32_0 = arith.constant 0 : i32
    %c0_i32_1 = arith.constant 0 : i32
    return %c0_i32, %c0_i32_0 : i32, i32
  }
  func.func @transform_2(%arg0: i32) -> (i32, i32) {
    %c0_i32 = arith.constant 0 : i32
    %c0_i32_0 = arith.constant 0 : i32
    %c0_i32_1 = arith.constant 0 : i32
    return %c0_i32, %c0_i32_0 : i32, i32
  }
  func.func @transform_3(%arg0: i32) -> (i32, i32) {
    %c0_i32 = arith.constant 0 : i32
    %c0_i32_0 = arith.constant 0 : i32
    %c0_i32_1 = arith.constant 0 : i32
    return %c0_i32, %c0_i32_0 : i32, i32
  }
  func.func @transform_4(%arg0: i32) -> (i32, i32) {
    %c0_i32 = arith.constant 0 : i32
    %c0_i32_0 = arith.constant 0 : i32
    %c0_i32_1 = arith.constant 0 : i32
    return %c0_i32, %c0_i32_0 : i32, i32
  }
  func.func @transform_5(%arg0: i32) -> (i32, i32) {
    %c0_i32 = arith.constant 0 : i32
    %c0_i32_0 = arith.constant 0 : i32
    return %arg0, %c0_i32 : i32, i32
  }
}

</mosaic_0001>

<bundles_post_ra>
// kernel: _feed_forward_impl.1
= control target key start
LH: loop header
LB: loop body
LE: loop exit
PB: predicated region body
PF: predicated region fallthrough
CT: control target
= control target key end

     0   :  { %10 = vsyncpa [#allocation3], 0  ;;  %s6885_s0 = inlined_call_operand.hbm [shape: f32[16,384], index: 0, kind: input, shape index: {}]   ;;  %s6886_s1 = inlined_call_operand.hbm [shape: bf16[384,1536], index: 1, kind: input, shape index: {}]   ;;  %s6887_s2 = inlined_call_operand.hbm [shape: f32[1,1536], index: 2, kind: input, shape index: {}]   ;;  %s6888_s3 = inlined_call_operand.hbm [shape: bf16[1536,384], index: 3, kind: input, shape index: {}]   ;;  %s6889_s4 = inlined_call_operand.hbm [shape: f32[1,384], index: 4, kind: input, shape index: {}]   ;;  %s6890_s5 = inlined_call_operand.hbm [shape: f32[16,384], index: 5, kind: output, shape index: {}]  }
   0x1   :  { %11 = vsyncpa [#allocation6], 0 }
   0x2   :  { %12 = vsyncpa [#allocation9], 0 }
   0x3   :  { %13 = vsyncpa [#allocation4], 0  ;;  %s6655_s18 = smov [#allocation5]   ;;  %s6515_s22 = scalar_lea.hbm %s6886_s1, 36864 }
   0x4   :  { %s31_s19 = sshll.u32 %s6655_s18, 4  ;;  %p6516_p0 = scmp.ne.s32.totalorder %s6886_s1, %s6515_s22  ;;  %s32_s19 = int_to_ptr.vmem [resolvable:$true] %s31_s19 }
   0x5   :  { %p6519_p1 = scmp.lt.u32.totalorder %s6515_s22, %s6886_s1 }
   0x7   :  { %p6521_p2 = pnand %p6519_p1, %p6516_p0 }
   0x9   :  { %6524 = shalt.err (!%p6521_p2)
}
   0xa   :  { %s6525_s27 = scalar_lea.vmem %s32_s19, 36864  ;;  %p6530_p4 = scmp.lt.s32.totalorder %s32_s19, %s32_s19 }
   0xb   :  { %p6526_p3 = scmp.ne.s32.totalorder %s32_s19, %s6525_s27  ;;  %p6531_p5 = scmp.lt.s32.totalorder %s6525_s27, %s6525_s27 }
   0xd   :  { %p6532_p6 = por %p6531_p5, %p6530_p4 }
   0xf   :  { %p6533_p7 = pnand %p6532_p6, %p6526_p3 }
  0x11   :  { %6536 = shalt.err (!%p6533_p7)
}
  0x12   :  { %s6656_s28 = smov 768   ;;  %s6657_s29 = smov 48  }
  0x13   :  { %37 = dma.hbm_to_vmem [thread:$0]  %s6886_s1, 36864, %s32_s19, [#allocation6], %s6656_s28, %s6656_s28, %s6657_s29  }
  0x14   :  { %s6658_s7 = smov [#allocation8]   ;;  %s6537_s11 = scalar_lea.hbm %s6888_s3, 36864 }
  0x15   :  { %s53_s8 = sshll.u32 %s6658_s7, 4  ;;  %p6538_p8 = scmp.ne.s32.totalorder %s6888_s3, %s6537_s11  ;;  %s54_s8 = int_to_ptr.vmem [resolvable:$true] %s53_s8 }
  0x16   :  { %p6541_p9 = scmp.lt.u32.totalorder %s6537_s11, %s6888_s3 }
  0x18   :  { %p6543_p10 = pnand %p6541_p9, %p6538_p8 }
  0x1a   :  { %6546 = shalt.err (!%p6543_p10)
}
  0x1b   :  { %s6547_s16 = scalar_lea.vmem %s54_s8, 36864  ;;  %p6552_p12 = scmp.lt.s32.totalorder %s54_s8, %s54_s8 }
  0x1c   :  { %p6548_p11 = scmp.ne.s32.totalorder %s54_s8, %s6547_s16  ;;  %p6553_p13 = scmp.lt.s32.totalorder %s6547_s16, %s6547_s16 }
  0x1e   :  { %p6554_p0 = por %p6553_p13, %p6552_p12 }
  0x20   :  { %p6555_p1 = pnand %p6554_p0, %p6548_p11 }
  0x22   :  { %6558 = shalt.err (!%p6555_p1)
}
  0x23   :  { %s6659_s1 = smov 192   ;;  %s6660_s17 = smov 12  }
  0x24   :  { %59 = dma.hbm_to_vmem [thread:$0]  %s6888_s3, 36864, %s54_s8, [#allocation9], %s6659_s1, %s6659_s1, %s6660_s17  }
  0x25   :  { %s6661_s20 = smov [#allocation2]   ;;  %s6559_s24 = scalar_lea.hbm %s6885_s0, 768 }
  0x26   :  { %s19_s21 = sshll.u32 %s6661_s20, 4  ;;  %p6560_p2 = scmp.ne.s32.totalorder %s6885_s0, %s6559_s24  ;;  %s20_s21 = int_to_ptr.vmem [resolvable:$true] %s19_s21 }
  0x27   :  { %p6563_p3 = scmp.lt.u32.totalorder %s6559_s24, %s6885_s0 }
  0x29   :  { %p6565_p4 = pnand %p6563_p3, %p6560_p2 }
  0x2b   :  { %6568 = shalt.err (!%p6565_p4)
}
  0x2c   :  { %s6569_s29 = scalar_lea.vmem %s20_s21, 768  ;;  %p6574_p6 = scmp.lt.s32.totalorder %s20_s21, %s20_s21 }
  0x2d   :  { %p6570_p5 = scmp.ne.s32.totalorder %s20_s21, %s6569_s29  ;;  %p6575_p7 = scmp.lt.s32.totalorder %s6569_s29, %s6569_s29 }
  0x2f   :  { %p6576_p8 = por %p6575_p7, %p6574_p6 }
  0x31   :  { %p6577_p9 = pnand %p6576_p8, %p6570_p5 }
  0x33   :  { %6580 = shalt.err (!%p6577_p9)
}
  0x34   :  { %s6662_s3 = smov 384   ;;  %s6663_s30 = smov 24  }
  0x35   :  { %25 = dma.hbm_to_vmem [thread:$0]  %s6885_s0, 768, %s20_s21, [#allocation3], %s6662_s3, %s6662_s3, %s6663_s30  }
  0x36   :  { %s6664_s8 = smov [#allocation7]   ;;  %s6665_s10 = smov [#allocation10]  }
  0x37   :  { %s44_s9 = sshll.u32 %s6664_s8, 4  ;;  %s66_s11 = sshll.u32 %s6665_s10, 4  ;;  %s45_s9 = int_to_ptr.vmem [resolvable:$true] %s44_s9  ;;  %s67_s11 = int_to_ptr.vmem [resolvable:$true] %s66_s11 }
  0x38   :  { %s6581_s14 = scalar_lea.hbm %s6887_s2, 192 }
  0x39   :  { %p6582_p10 = scmp.ne.s32.totalorder %s6887_s2, %s6581_s14  ;;  %p6585_p11 = scmp.lt.u32.totalorder %s6581_s14, %s6887_s2 }
  0x3b   :  { %p6587_p12 = pnand %p6585_p11, %p6582_p10 }
  0x3d   :  { %6590 = shalt.err (!%p6587_p12)
}
  0x3e   :  { %s6591_s0 = scalar_lea.vmem %s45_s9, 192  ;;  %p6596_p0 = scmp.lt.s32.totalorder %s45_s9, %s45_s9 }
  0x3f   :  { %p6592_p13 = scmp.ne.s32.totalorder %s45_s9, %s6591_s0  ;;  %p6597_p1 = scmp.lt.s32.totalorder %s6591_s0, %s6591_s0 }
  0x41   :  { %p6598_p2 = por %p6597_p1, %p6596_p0 }
  0x43   :  { %p6599_p3 = pnand %p6598_p2, %p6592_p13 }
  0x45   :  { %6602 = shalt.err (!%p6599_p3)
}
  0x46   :  { %47 = dma.hbm_to_vmem [thread:$0]  %s6887_s2, 192, %s45_s9, [#allocation6]  }
  0x47   :  { %s6603_s22 = scalar_lea.hbm %s6889_s4, 48 }
  0x48   :  { %p6604_p4 = scmp.ne.s32.totalorder %s6889_s4, %s6603_s22  ;;  %p6607_p5 = scmp.lt.u32.totalorder %s6603_s22, %s6889_s4 }
  0x4a   :  { %p6609_p6 = pnand %p6607_p5, %p6604_p4 }
  0x4c   :  { %6612 = shalt.err (!%p6609_p6)
}
  0x4d   :  { %s6613_s27 = scalar_lea.vmem %s67_s11, 48  ;;  %s6617_s28 = scalar_lea.vmem %s67_s11, 64 }
  0x4e   :  { %p6614_p7 = scmp.ne.s32.totalorder %s67_s11, %s6613_s27  ;;  %p6618_p8 = scmp.lt.s32.totalorder %s67_s11, %s67_s11 }
  0x4f   :  { %p6619_p9 = scmp.lt.s32.totalorder %s6617_s28, %s6613_s27 }
  0x51   :  { %p6620_p10 = por %p6619_p9, %p6618_p8 }
  0x53   :  { %p6621_p11 = pnand %p6620_p10, %p6614_p7 }
  0x55   :  { %6624 = shalt.err (!%p6621_p11)
}
  0x56   :  { %69 = dma.hbm_to_vmem [thread:$0]  %s6889_s4, 48, %s67_s11, [#allocation9]  }
  0x57   :  { %6647 = dma.done.wait [#allocation3], 768  }
  0x58   :  { %6648 = vsyncadd [#allocation3], 4294966528 }
  0x59   :  { %6649 = dma.done.wait [#allocation6], 37056  }
  0x5a   :  { %6650 = vsyncadd [#allocation6], 4294930240 }
  0x5b   :  { %6651 = dma.done.wait [#allocation9], 36912  }
  0x5c   :  { %6652 = vsyncadd [#allocation9], 4294930384  ;;  %v5698_v0 = vld [vmem:[#allocation5 + $0x4] ss:$48 sps:$4 sm:$0xff]   ;;  %v5700_v1 = vld [vmem:[#allocation5] ss:$48 sps:$4 sm:$0xff]  }
  0x5d   :  { %1887 = vmatprep.subr.bf16.mxu1 %v5698_v0  ;;  %v5701_v2 = vld [vmem:[#allocation5 + $0x64] ss:$48 sps:$4 sm:$0xff]   ;;  %v5703_v3 = vld [vmem:[#allocation5 + $0x60] ss:$48 sps:$4 sm:$0xff]   ;;  %v87_v18 = vld [vmem:[#allocation2 + $0x8] sm:$0xff]  ;;  %s6667_s4 = smov [#allocation11]  }
  0x5e   :  { %1888 = vmatpush1.bf16.msra.mxu1 %v5700_v1  ;;  %v5704_v4 = vld [vmem:[#allocation5 + $0xc4] ss:$48 sps:$4 sm:$0xff]   ;;  %v5706_v5 = vld [vmem:[#allocation5 + $0xc0] ss:$48 sps:$4 sm:$0xff]   ;;  %v89_v58 = vld [vmem:[#allocation2 + $0x18] sm:$0xff]  ;;  %s4891_s6 = sshll.u32 %s6667_s4, 4  ;;  %s4892_s6 = int_to_ptr.vmem [resolvable:$true] %s4891_s6 }
  0x5f   :  { %1889 = vmatprep.subr.bf16.mxu1 %v5701_v2  ;;  %v5707_v6 = vld [vmem:[#allocation5 + $0x124] ss:$48 sps:$4 sm:$0xff]   ;;  %v5709_v7 = vld [vmem:[#allocation5 + $0x120] ss:$48 sps:$4 sm:$0xff]   ;;  %s6625_s7 = scalar_lea.vmem %s4892_s6, 768  ;;  %p6630_p13 = scmp.lt.s32.totalorder %s4892_s6, %s4892_s6 }
  0x60   :  { %v5710_v8 = vld [vmem:[#allocation5 + $0x184] ss:$48 sps:$4 sm:$0xff]   ;;  %v5712_v9 = vld [vmem:[#allocation5 + $0x180] ss:$48 sps:$4 sm:$0xff]   ;;  %p6626_p12 = scmp.ne.s32.totalorder %s4892_s6, %s6625_s7  ;;  %p6631_p0 = scmp.lt.s32.totalorder %s6625_s7, %s6625_s7 }
  0x61   :  { %v5713_v10 = vld [vmem:[#allocation5 + $0x1e4] ss:$48 sps:$4 sm:$0xff]   ;;  %v5715_v11 = vld [vmem:[#allocation5 + $0x1e0] ss:$48 sps:$4 sm:$0xff]  }
  0x62   :  { %1890 = vmatpush1.bf16.msra.mxu1 %v5703_v3  ;;  %v5716_v12 = vld [vmem:[#allocation5 + $0x244] ss:$48 sps:$4 sm:$0xff]   ;;  %v5718_v14 = vld [vmem:[#allocation5 + $0x240] ss:$48 sps:$4 sm:$0xff]   ;;  %v6666_v3 = vmov 0   ;;  %p6632_p1 = por %p6631_p0, %p6630_p13 }
  0x63   :  { %1891 = vmatprep.subr.bf16.mxu1 %v5704_v4  ;;  %v5743_v13 = vld [vmem:[#allocation5 + $0x14] ss:$48 sps:$4 sm:$0xff]   ;;  %v5747_v16 = vld [vmem:[#allocation5 + $0x10] ss:$48 sps:$4 sm:$0xff]  }
  0x64   :  { %v5719_v15 = vld [vmem:[#allocation5 + $0x2a4] ss:$48 sps:$4 sm:$0xff]   ;;  %2059 = vmatprep.subr.bf16.mxu0 %v5743_v13  ;;  %v5754_v21 = vld [vmem:[#allocation5 + $0x70] ss:$48 sps:$4 sm:$0xff]   ;;  %p6633_p2 = pnand %p6632_p1, %p6626_p12 }
  0x65   :  { %v5749_v17 = vld [vmem:[#allocation5 + $0x74] ss:$48 sps:$4 sm:$0xff]   ;;  %2060 = vmatpush1.bf16.msra.mxu0 %v5747_v16  ;;  %v5721_v22 = vld [vmem:[#allocation5 + $0x2a0] ss:$48 sps:$4 sm:$0xff]  }
  0x66   :  { %1892 = vmatpush1.bf16.msra.mxu1 %v5706_v5  ;;  %v90_v19 = vld [vmem:[#allocation2 + $0x20] sm:$0xff]  ;;  %2061 = vmatprep.subr.bf16.mxu0 %v5749_v17 }
  0x67   :  { %1893 = vmatprep.subr.bf16.mxu1 %v5707_v6  ;;  %v6761_v20 = vpack.c.bf16 %v90_v19, %v87_v18  ;;  %v5755_v23 = vld [vmem:[#allocation5 + $0xd4] ss:$48 sps:$4 sm:$0xff]   ;;  %v5760_v25 = vld [vmem:[#allocation5 + $0xd0] ss:$48 sps:$4 sm:$0xff]  }
  0x68   :  { %v5722_v24 = vld [vmem:[#allocation5 + $0x304] ss:$48 sps:$4 sm:$0xff]   ;;  %v5724_v27 = vld [vmem:[#allocation5 + $0x300] ss:$48 sps:$4 sm:$0xff]  }
  0x69   :  { %1919 = vmatprep.mubr.bf16.mxu1 %v6761_v20  ;;  %2062 = vmatpush1.bf16.msra.mxu0 %v5754_v21  ;;  %v5761_v26 = vld [vmem:[#allocation5 + $0x134] ss:$48 sps:$4 sm:$0xff]   ;;  %v5766_v29 = vld [vmem:[#allocation5 + $0x130] ss:$48 sps:$4 sm:$0xff]  }
  0x6a   :  { %1894 = vmatpush1.bf16.msra.mxu1 %v5709_v7  ;;  %2063 = vmatprep.subr.bf16.mxu0 %v5755_v23  ;;  %v5725_v28 = vld [vmem:[#allocation5 + $0x364] ss:$48 sps:$4 sm:$0xff]   ;;  %v5727_v31 = vld [vmem:[#allocation5 + $0x360] ss:$48 sps:$4 sm:$0xff]  }
  0x6b   :  { %1895 = vmatprep.subr.bf16.mxu1 %v5710_v8  ;;  %2091 = vmatprep.mubr.bf16.mxu0 %v6761_v20  ;;  %v5767_v30 = vld [vmem:[#allocation5 + $0x194] ss:$48 sps:$4 sm:$0xff]   ;;  %v5772_v33 = vld [vmem:[#allocation5 + $0x190] ss:$48 sps:$4 sm:$0xff]  }
  0x6c   :  { %v5728_v32 = vld [vmem:[#allocation5 + $0x3c4] ss:$48 sps:$4 sm:$0xff]   ;;  %v5730_v35 = vld [vmem:[#allocation5 + $0x3c0] ss:$48 sps:$4 sm:$0xff]  }
  0x6d   :  { %2064 = vmatpush1.bf16.msra.mxu0 %v5760_v25  ;;  %v5773_v34 = vld [vmem:[#allocation5 + $0x1f4] ss:$48 sps:$4 sm:$0xff]   ;;  %v5778_v37 = vld [vmem:[#allocation5 + $0x1f0] ss:$48 sps:$4 sm:$0xff]  }
  0x6e   :  { %1896 = vmatpush1.bf16.msra.mxu1 %v5712_v9  ;;  %2065 = vmatprep.subr.bf16.mxu0 %v5761_v26  ;;  %v5731_v36 = vld [vmem:[#allocation5 + $0x424] ss:$48 sps:$4 sm:$0xff]   ;;  %v5733_v39 = vld [vmem:[#allocation5 + $0x420] ss:$48 sps:$4 sm:$0xff]  }
  0x6f   :  { %1897 = vmatprep.subr.bf16.mxu1 %v5713_v10  ;;  %v5779_v38 = vld [vmem:[#allocation5 + $0x254] ss:$48 sps:$4 sm:$0xff]   ;;  %v5784_v41 = vld [vmem:[#allocation5 + $0x250] ss:$48 sps:$4 sm:$0xff]  }
  0x70   :  { %v5734_v40 = vld [vmem:[#allocation5 + $0x484] ss:$48 sps:$4 sm:$0xff]   ;;  %v5736_v43 = vld [vmem:[#allocation5 + $0x480] ss:$48 sps:$4 sm:$0xff]  }
  0x71   :  { %2066 = vmatpush1.bf16.msra.mxu0 %v5766_v29  ;;  %v5785_v42 = vld [vmem:[#allocation5 + $0x2b4] ss:$48 sps:$4 sm:$0xff]   ;;  %v5790_v45 = vld [vmem:[#allocation5 + $0x2b0] ss:$48 sps:$4 sm:$0xff]  }
  0x72   :  { %1898 = vmatpush1.bf16.msra.mxu1 %v5715_v11  ;;  %2067 = vmatprep.subr.bf16.mxu0 %v5767_v30  ;;  %v5737_v44 = vld [vmem:[#allocation5 + $0x4e4] ss:$48 sps:$4 sm:$0xff]   ;;  %v5739_v47 = vld [vmem:[#allocation5 + $0x4e0] ss:$48 sps:$4 sm:$0xff]   ;;  %v91_v30 = vld [vmem:[#allocation2 + $0x28] sm:$0xff] }
  0x73   :  { %1899 = vmatprep.subr.bf16.mxu1 %v5716_v12  ;;  %v5791_v46 = vld [vmem:[#allocation5 + $0x314] ss:$48 sps:$4 sm:$0xff]   ;;  %v5796_v49 = vld [vmem:[#allocation5 + $0x310] ss:$48 sps:$4 sm:$0xff]  }
  0x74   :  { %v5740_v48 = vld [vmem:[#allocation5 + $0x544] ss:$48 sps:$4 sm:$0xff]   ;;  %v5742_v51 = vld [vmem:[#allocation5 + $0x540] ss:$48 sps:$4 sm:$0xff]  }
  0x75   :  { %2068 = vmatpush1.bf16.msra.mxu0 %v5772_v33  ;;  %v5797_v50 = vld [vmem:[#allocation5 + $0x374] ss:$48 sps:$4 sm:$0xff]   ;;  %v5802_v53 = vld [vmem:[#allocation5 + $0x370] ss:$48 sps:$4 sm:$0xff]  }
  0x76   :  { %1900 = vmatpush1.bf16.msra.mxu1 %v5718_v14  ;;  %2069 = vmatprep.subr.bf16.mxu0 %v5773_v34  ;;  %v5745_v52 = vld [vmem:[#allocation5 + $0x5a4] ss:$48 sps:$4 sm:$0xff]   ;;  %v5748_v54 = vld [vmem:[#allocation5 + $0x5a0] ss:$48 sps:$4 sm:$0xff]  }
  0x77   :  { %1901 = vmatprep.subr.bf16.mxu1 %v5719_v15  ;;  %v5803_v55 = vld [vmem:[#allocation5 + $0x3d4] ss:$48 sps:$4 sm:$0xff]   ;;  %v5808_v59 = vld [vmem:[#allocation5 + $0x3d0] ss:$48 sps:$4 sm:$0xff]  }
  0x78   :  { %v5753_v56 = vld [vmem:[#allocation5 + $0x604] ss:$48 sps:$4 sm:$0xff]   ;;  %v5751_v62 = vld [vmem:[#allocation5 + $0x600] ss:$48 sps:$4 sm:$0xff]  }
  0x79   :  { %2070 = vmatpush1.bf16.msra.mxu0 %v5778_v37  ;;  %v86_v57 = vld [vmem:[#allocation2] sm:$0xff]  ;;  %v88_v29 = vld [vmem:[#allocation2 + $0x10] sm:$0xff] }
  0x7a   :  { %1902 = vmatpush1.bf16.msra.mxu1 %v5721_v22  ;;  %2071 = vmatprep.subr.bf16.mxu0 %v5779_v38  ;;  %v5809_v60 = vld [vmem:[#allocation5 + $0x434] ss:$48 sps:$4 sm:$0xff]   ;;  %v6765_v61 = vpack.c.bf16 %v89_v58, %v86_v57  ;;  %v5814_v0 = vld [vmem:[#allocation5 + $0x430] ss:$48 sps:$4 sm:$0xff]   ;;  %v6771_v34 = vpack.c.bf16 %v91_v30, %v88_v29  ;;  %v5884_v30 = vld [vmem:[#allocation5 + $0x548] ss:$48 sps:$4 sm:$0xff]  }
  0x7b   :  { %1903 = vmatprep.subr.bf16.mxu1 %v5722_v24  ;;  %v5759_v63 = vld [vmem:[#allocation5 + $0x664] ss:$48 sps:$4 sm:$0xff]   ;;  %v5757_v2 = vld [vmem:[#allocation5 + $0x660] ss:$48 sps:$4 sm:$0xff]  }
  0x7c   :  { %v5815_v1 = vld [vmem:[#allocation5 + $0x494] ss:$48 sps:$4 sm:$0xff]   ;;  %v5820_v5 = vld [vmem:[#allocation5 + $0x490] ss:$48 sps:$4 sm:$0xff]  }
  0x7d   :  { %2072 = vmatpush1.bf16.msra.mxu0 %v5784_v41  ;;  %v5765_v4 = vld [vmem:[#allocation5 + $0x6c4] ss:$48 sps:$4 sm:$0xff]   ;;  %v5763_v7 = vld [vmem:[#allocation5 + $0x6c0] ss:$48 sps:$4 sm:$0xff]  }
  0x7e   :  { %1904 = vmatpush1.bf16.msra.mxu1 %v5724_v27  ;;  %2073 = vmatprep.subr.bf16.mxu0 %v5785_v42  ;;  %v5821_v6 = vld [vmem:[#allocation5 + $0x4f4] ss:$48 sps:$4 sm:$0xff]   ;;  %v5826_v9 = vld [vmem:[#allocation5 + $0x4f0] ss:$48 sps:$4 sm:$0xff]  }
  0x7f   :  { %1905 = vmatprep.subr.bf16.mxu1 %v5725_v28  ;;  %v5771_v8 = vld [vmem:[#allocation5 + $0x724] ss:$48 sps:$4 sm:$0xff]   ;;  %v5769_v11 = vld [vmem:[#allocation5 + $0x720] ss:$48 sps:$4 sm:$0xff]  }
  0x80   :  { %v5827_v10 = vld [vmem:[#allocation5 + $0x554] ss:$48 sps:$4 sm:$0xff]   ;;  %v5832_v13 = vld [vmem:[#allocation5 + $0x550] ss:$48 sps:$4 sm:$0xff]  }
  0x81   :  { %2074 = vmatpush1.bf16.msra.mxu0 %v5790_v45  ;;  %v5777_v12 = vld [vmem:[#allocation5 + $0x784] ss:$48 sps:$4 sm:$0xff]   ;;  %v5775_v15 = vld [vmem:[#allocation5 + $0x780] ss:$48 sps:$4 sm:$0xff]  }
  0x82   :  { %1906 = vmatpush1.bf16.msra.mxu1 %v5727_v31  ;;  %2075 = vmatprep.subr.bf16.mxu0 %v5791_v46  ;;  %v5833_v14 = vld [vmem:[#allocation5 + $0x5b4] ss:$48 sps:$4 sm:$0xff]   ;;  %v5838_v17 = vld [vmem:[#allocation5 + $0x5b0] ss:$48 sps:$4 sm:$0xff]   ;;  %v5801_v31 = vld [vmem:[#allocation5 + $0xc] ss:$48 sps:$4 sm:$0xff]  }
  0x83   :  { %1907 = vmatprep.subr.bf16.mxu1 %v5728_v32  ;;  %v5783_v16 = vld [vmem:[#allocation5 + $0x7e4] ss:$48 sps:$4 sm:$0xff]   ;;  %v5781_v19 = vld [vmem:[#allocation5 + $0x7e0] ss:$48 sps:$4 sm:$0xff]  }
  0x84   :  { %v5841_v18 = vld [vmem:[#allocation5 + $0x614] ss:$48 sps:$4 sm:$0xff]   ;;  %v5839_v22 = vld [vmem:[#allocation5 + $0x610] ss:$48 sps:$4 sm:$0xff]  }
  0x85   :  { %2076 = vmatpush1.bf16.msra.mxu0 %v5796_v49  ;;  %v5789_v21 = vld [vmem:[#allocation5 + $0x844] ss:$48 sps:$4 sm:$0xff]   ;;  %v5787_v24 = vld [vmem:[#allocation5 + $0x840] ss:$48 sps:$4 sm:$0xff]  }
  0x86   :  { %1908 = vmatpush1.bf16.msra.mxu1 %v5730_v35  ;;  %2077 = vmatprep.subr.bf16.mxu0 %v5797_v50  ;;  %v5847_v23 = vld [vmem:[#allocation5 + $0x674] ss:$48 sps:$4 sm:$0xff]   ;;  %v5845_v26 = vld [vmem:[#allocation5 + $0x670] ss:$48 sps:$4 sm:$0xff]   ;;  %v5799_v35 = vld [vmem:[#allocation5 + $0x8] ss:$48 sps:$4 sm:$0xff]  }
  0x87   :  { %1909 = vmatprep.subr.bf16.mxu1 %v5731_v36  ;;  %v5795_v25 = vld [vmem:[#allocation5 + $0x8a4] ss:$48 sps:$4 sm:$0xff]   ;;  %v5793_v27 = vld [vmem:[#allocation5 + $0x8a0] ss:$48 sps:$4 sm:$0xff]   ;;  %v5807_v36 = vld [vmem:[#allocation5 + $0x6c] ss:$48 sps:$4 sm:$0xff]  }
  0x88   :  { %v5853_v28 = vld [vmem:[#allocation5 + $0x6d4] ss:$48 sps:$4 sm:$0xff]   ;;  %v5851_v32 = vld [vmem:[#allocation5 + $0x6d0] ss:$48 sps:$4 sm:$0xff]  }
  0x89   :  { %2078 = vmatpush1.bf16.msra.mxu0 %v5802_v53  ;;  %v5859_v33 = vld [vmem:[#allocation5 + $0x734] ss:$48 sps:$4 sm:$0xff]   ;;  %v5857_v37 = vld [vmem:[#allocation5 + $0x730] ss:$48 sps:$4 sm:$0xff]  }
  0x8a   :  { %1910 = vmatpush1.bf16.msra.mxu1 %v5733_v39  ;;  %2079 = vmatprep.subr.bf16.mxu0 %v5803_v55  ;;  %v5865_v38 = vld [vmem:[#allocation5 + $0x794] ss:$48 sps:$4 sm:$0xff]   ;;  %v5805_v39 = vld [vmem:[#allocation5 + $0x68] ss:$48 sps:$4 sm:$0xff]   ;;  %v5863_v41 = vld [vmem:[#allocation5 + $0x790] ss:$48 sps:$4 sm:$0xff]  }
  0x8b   :  { %1911 = vmatprep.subr.bf16.mxu1 %v5734_v40  ;;  %v5813_v40 = vld [vmem:[#allocation5 + $0xcc] ss:$48 sps:$4 sm:$0xff]   ;;  %v5871_v42 = vld [vmem:[#allocation5 + $0x7f4] ss:$48 sps:$4 sm:$0xff]   ;;  %v5869_v45 = vld [vmem:[#allocation5 + $0x7f0] ss:$48 sps:$4 sm:$0xff]  }
  0x8c   :  { %v5877_v46 = vld [vmem:[#allocation5 + $0x854] ss:$48 sps:$4 sm:$0xff]   ;;  %v5875_v49 = vld [vmem:[#allocation5 + $0x850] ss:$48 sps:$4 sm:$0xff]   ;;  %v5829_v55 = vld [vmem:[#allocation5 + $0x1e8] ss:$48 sps:$4 sm:$0xff]  }
  0x8d   :  { %2080 = vmatpush1.bf16.msra.mxu0 %v5808_v59  ;;  %v5883_v50 = vld [vmem:[#allocation5 + $0x8b4] ss:$48 sps:$4 sm:$0xff]   ;;  %v5881_v53 = vld [vmem:[#allocation5 + $0x8b0] ss:$48 sps:$4 sm:$0xff]   ;;  %v5835_v59 = vld [vmem:[#allocation5 + $0x248] ss:$48 sps:$4 sm:$0xff]  }
  0x8e   :  { %1912 = vmatpush1.bf16.msra.mxu1 %v5736_v43  ;;  %2081 = vmatprep.subr.bf16.mxu0 %v5809_v60  ;;  %v5811_v43 = vld [vmem:[#allocation5 + $0xc8] ss:$48 sps:$4 sm:$0xff]   ;;  %v5887_v57 = vld [vmem:[#allocation5 + $0x20] ss:$48 sps:$4 sm:$0xff]   ;;  %v5895_v58 = vld [vmem:[#allocation5 + $0x84] ss:$48 sps:$4 sm:$0xff]  }
  0x8f   :  { %1913 = vmatprep.subr.bf16.mxu1 %v5737_v44  ;;  %v5819_v44 = vld [vmem:[#allocation5 + $0x12c] ss:$48 sps:$4 sm:$0xff]   ;;  %v5943_v29 = vld [vmem:[#allocation5 + $0x384] ss:$48 sps:$4 sm:$0xff]  }
  0x90   :  { %v5844_v60 = vld [vmem:[#allocation5 + $0x2ac] ss:$48 sps:$4 sm:$0xff]  }
  0x91   :  { %2082 = vmatpush1.bf16.msra.mxu0 %v5814_v0  ;;  %v5842_v0 = vld [vmem:[#allocation5 + $0x2a8] ss:$48 sps:$4 sm:$0xff]  }
  0x92   :  { %1914 = vmatpush1.bf16.msra.mxu1 %v5739_v47  ;;  %2083 = vmatprep.subr.bf16.mxu0 %v5815_v1  ;;  %v5817_v47 = vld [vmem:[#allocation5 + $0x128] ss:$48 sps:$4 sm:$0xff]   ;;  %v5850_v1 = vld [vmem:[#allocation5 + $0x30c] ss:$48 sps:$4 sm:$0xff]  }
  0x93   :  { %1915 = vmatprep.subr.bf16.mxu1 %v5740_v48  ;;  %v5825_v48 = vld [vmem:[#allocation5 + $0x18c] ss:$48 sps:$4 sm:$0xff]  }
  0x95   :  { %2084 = vmatpush1.bf16.msra.mxu0 %v5820_v5  ;;  %v5848_v5 = vld [vmem:[#allocation5 + $0x308] ss:$48 sps:$4 sm:$0xff]  }
  0x96   :  { %1916 = vmatpush1.bf16.msra.mxu1 %v5742_v51  ;;  %2085 = vmatprep.subr.bf16.mxu0 %v5821_v6  ;;  %v5823_v51 = vld [vmem:[#allocation5 + $0x188] ss:$48 sps:$4 sm:$0xff]   ;;  %v5856_v6 = vld [vmem:[#allocation5 + $0x36c] ss:$48 sps:$4 sm:$0xff]  }
  0x97   :  { %1917 = vmatprep.subr.bf16.mxu1 %v5745_v52  ;;  %v5831_v52 = vld [vmem:[#allocation5 + $0x1ec] ss:$48 sps:$4 sm:$0xff]  }
  0x99   :  { %2086 = vmatpush1.bf16.msra.mxu0 %v5826_v9  ;;  %v5854_v9 = vld [vmem:[#allocation5 + $0x368] ss:$48 sps:$4 sm:$0xff]  }
  0x9a   :  { %1918 = vmatpush1.bf16.msra.mxu1 %v5748_v54  ;;  %2087 = vmatprep.subr.bf16.mxu0 %v5827_v10  ;;  %v5889_v54 = vld [vmem:[#allocation5 + $0x24] ss:$48 sps:$4 sm:$0xff]   ;;  %v5862_v10 = vld [vmem:[#allocation5 + $0x3cc] ss:$48 sps:$4 sm:$0xff]  }
  0x9b   :  { %1930 = vmatprep.subr.bf16.mxu1 %v5753_v56  ;;  %v5837_v56 = vld [vmem:[#allocation5 + $0x24c] ss:$48 sps:$4 sm:$0xff]  }
  0x9d   :  { %1920 = vmatmul.mubr.bf16.vlgmr.msra.gmra.mrb[0].mxu1 %v6765_v61  ;;  %2088 = vmatpush1.bf16.msra.mxu0 %v5832_v13  ;;  %v5860_v13 = vld [vmem:[#allocation5 + $0x3c8] ss:$48 sps:$4 sm:$0xff]  }
  0x9e   :  { %1931 = vmatpush1.bf16.msra.mxu1 %v5751_v62  ;;  %1962 = vmatprep.mubr.bf16.mxu1 %v6666_v3  ;;  %v5893_v62 = vld [vmem:[#allocation5 + $0x80] ss:$48 sps:$4 sm:$0xff]  }
  0x9f   :  { %1932 = vmatprep.subr.bf16.mxu1 %v5759_v63  ;;  %2089 = vmatprep.subr.bf16.mxu0 %v5833_v14  ;;  %v5901_v63 = vld [vmem:[#allocation5 + $0xe4] ss:$48 sps:$4 sm:$0xff]   ;;  %v5868_v14 = vld [vmem:[#allocation5 + $0x42c] ss:$48 sps:$4 sm:$0xff]  }
  0xa1   :  { %2090 = vmatpush1.bf16.msra.mxu0 %v5838_v17  ;;  %v5866_v17 = vld [vmem:[#allocation5 + $0x428] ss:$48 sps:$4 sm:$0xff]  }
  0xa2   :  { %1933 = vmatpush1.bf16.msra.mxu1 %v5757_v2  ;;  %2102 = vmatprep.subr.bf16.mxu0 %v5841_v18  ;;  %v5899_v2 = vld [vmem:[#allocation5 + $0xe0] ss:$48 sps:$4 sm:$0xff]   ;;  %v5874_v18 = vld [vmem:[#allocation5 + $0x48c] ss:$48 sps:$4 sm:$0xff]  }
  0xa3   :  { %1934 = vmatprep.subr.bf16.mxu1 %v5765_v4  ;;  %v5907_v4 = vld [vmem:[#allocation5 + $0x144] ss:$48 sps:$4 sm:$0xff]  }
  0xa4   :  { %2092 = vmatmul.mubr.bf16.vlgmr.msra.gmra.mrb[0].mxu0 %v6765_v61 }
  0xa5   :  { %2103 = vmatpush1.bf16.msra.mxu0 %v5839_v22  ;;  %2134 = vmatprep.mubr.bf16.mxu0 %v6666_v3  ;;  %v5872_v22 = vld [vmem:[#allocation5 + $0x488] ss:$48 sps:$4 sm:$0xff]  }
  0xa6   :  { %1935 = vmatpush1.bf16.msra.mxu1 %v5763_v7  ;;  %2104 = vmatprep.subr.bf16.mxu0 %v5847_v23  ;;  %v5905_v7 = vld [vmem:[#allocation5 + $0x140] ss:$48 sps:$4 sm:$0xff]   ;;  %v5880_v23 = vld [vmem:[#allocation5 + $0x4ec] ss:$48 sps:$4 sm:$0xff]  }
  0xa7   :  { %1936 = vmatprep.subr.bf16.mxu1 %v5771_v8  ;;  %v5913_v8 = vld [vmem:[#allocation5 + $0x1a4] ss:$48 sps:$4 sm:$0xff]  }
  0xa9   :  { %2105 = vmatpush1.bf16.msra.mxu0 %v5845_v26  ;;  %v5878_v26 = vld [vmem:[#allocation5 + $0x4e8] ss:$48 sps:$4 sm:$0xff]  }
  0xaa   :  { %1937 = vmatpush1.bf16.msra.mxu1 %v5769_v11  ;;  %2106 = vmatprep.subr.bf16.mxu0 %v5853_v28  ;;  %v5911_v11 = vld [vmem:[#allocation5 + $0x1a0] ss:$48 sps:$4 sm:$0xff]  }
  0xab   :  { %1938 = vmatprep.subr.bf16.mxu1 %v5777_v12  ;;  %v5919_v12 = vld [vmem:[#allocation5 + $0x204] ss:$48 sps:$4 sm:$0xff]   ;;  %v5935_v28 = vld [vmem:[#allocation5 + $0x320] ss:$48 sps:$4 sm:$0xff]  }
  0xad   :  { %2107 = vmatpush1.bf16.msra.mxu0 %v5851_v32  ;;  %v5941_v32 = vld [vmem:[#allocation5 + $0x380] ss:$48 sps:$4 sm:$0xff]  }
  0xae   :  { %1939 = vmatpush1.bf16.msra.mxu1 %v5775_v15  ;;  %2108 = vmatprep.subr.bf16.mxu0 %v5859_v33  ;;  %v5917_v15 = vld [vmem:[#allocation5 + $0x200] ss:$48 sps:$4 sm:$0xff]   ;;  %v5949_v33 = vld [vmem:[#allocation5 + $0x3e4] ss:$48 sps:$4 sm:$0xff]  }
  0xaf   :  { %1940 = vmatprep.subr.bf16.mxu1 %v5783_v16  ;;  %v5925_v16 = vld [vmem:[#allocation5 + $0x264] ss:$48 sps:$4 sm:$0xff]  }
  0xb1   :  { %2109 = vmatpush1.bf16.msra.mxu0 %v5857_v37  ;;  %v5947_v37 = vld [vmem:[#allocation5 + $0x3e0] ss:$48 sps:$4 sm:$0xff]  }
  0xb2   :  { %1941 = vmatpush1.bf16.msra.mxu1 %v5781_v19  ;;  %2110 = vmatprep.subr.bf16.mxu0 %v5865_v38  ;;  %v5923_v19 = vld [vmem:[#allocation5 + $0x260] ss:$48 sps:$4 sm:$0xff]   ;;  %v5955_v38 = vld [vmem:[#allocation5 + $0x444] ss:$48 sps:$4 sm:$0xff]  }
  0xb3   :  { %1942 = vmatprep.subr.bf16.mxu1 %v5789_v21  ;;  %v5931_v21 = vld [vmem:[#allocation5 + $0x2c4] ss:$48 sps:$4 sm:$0xff]  }
  0xb5   :  { %2111 = vmatpush1.bf16.msra.mxu0 %v5863_v41  ;;  %v5953_v41 = vld [vmem:[#allocation5 + $0x440] ss:$48 sps:$4 sm:$0xff]  }
  0xb6   :  { %1943 = vmatpush1.bf16.msra.mxu1 %v5787_v24  ;;  %2112 = vmatprep.subr.bf16.mxu0 %v5871_v42  ;;  %v5929_v24 = vld [vmem:[#allocation5 + $0x2c0] ss:$48 sps:$4 sm:$0xff]   ;;  %v5961_v42 = vld [vmem:[#allocation5 + $0x4a4] ss:$48 sps:$4 sm:$0xff]  }
  0xb7   :  { %1944 = vmatprep.subr.bf16.mxu1 %v5795_v25  ;;  %v5937_v25 = vld [vmem:[#allocation5 + $0x324] ss:$48 sps:$4 sm:$0xff]  }
  0xb9   :  { %2113 = vmatpush1.bf16.msra.mxu0 %v5869_v45  ;;  %v5959_v45 = vld [vmem:[#allocation5 + $0x4a0] ss:$48 sps:$4 sm:$0xff]  }
  0xba   :  { %1945 = vmatpush1.bf16.msra.mxu1 %v5793_v27  ;;  %2114 = vmatprep.subr.bf16.mxu0 %v5877_v46  ;;  %v5886_v27 = vld [vmem:[#allocation5 + $0x54c] ss:$48 sps:$4 sm:$0xff]   ;;  %v5967_v46 = vld [vmem:[#allocation5 + $0x504] ss:$48 sps:$4 sm:$0xff]  }
  0xbb   :  { %1973 = vmatprep.subr.bf16.mxu1 %v5801_v31  ;;  %v5892_v31 = vld [vmem:[#allocation5 + $0x5ac] ss:$48 sps:$4 sm:$0xff]  }
  0xbd   :  { %1963 = vmatmul.mubr.bf16.vlgmr.msra.gmra.mrb[0].mxu1 %v6771_v34  ;;  %2115 = vmatpush1.bf16.msra.mxu0 %v5875_v49  ;;  %v5965_v49 = vld [vmem:[#allocation5 + $0x500] ss:$48 sps:$4 sm:$0xff]  }
  0xbe   :  { %1974 = vmatpush1.bf16.msra.mxu1 %v5799_v35  ;;  %2005 = vmatprep.mubr.bf16.mxu1 %v6761_v20  ;;  %v5890_v35 = vld [vmem:[#allocation5 + $0x5a8] ss:$48 sps:$4 sm:$0xff]  }
  0xbf   :  { %1975 = vmatprep.subr.bf16.mxu1 %v5807_v36  ;;  %2116 = vmatprep.subr.bf16.mxu0 %v5883_v50  ;;  %v5898_v36 = vld [vmem:[#allocation5 + $0x60c] ss:$48 sps:$4 sm:$0xff]   ;;  %v5973_v50 = vld [vmem:[#allocation5 + $0x564] ss:$48 sps:$4 sm:$0xff]  }
  0xc1   :  { %2117 = vmatpush1.bf16.msra.mxu0 %v5881_v53  ;;  %v5971_v53 = vld [vmem:[#allocation5 + $0x560] ss:$48 sps:$4 sm:$0xff]  }
  0xc2   :  { %1976 = vmatpush1.bf16.msra.mxu1 %v5805_v39  ;;  %2231 = vmatprep.subr.bf16.mxu0 %v5889_v54  ;;  %v5896_v39 = vld [vmem:[#allocation5 + $0x608] ss:$48 sps:$4 sm:$0xff]   ;;  %v5979_v54 = vld [vmem:[#allocation5 + $0x5c4] ss:$48 sps:$4 sm:$0xff]  }
  0xc3   :  { %1977 = vmatprep.subr.bf16.mxu1 %v5813_v40  ;;  %v5904_v40 = vld [vmem:[#allocation5 + $0x66c] ss:$48 sps:$4 sm:$0xff]  }
  0xc4   :  { %2135 = vmatmul.mubr.bf16.vlgmr.msra.gmra.mrb[0].mxu0 %v6771_v34 }
  0xc5   :  { %2232 = vmatpush1.bf16.msra.mxu0 %v5887_v57  ;;  %2263 = vmatprep.mubr.bf16.mxu0 %v6761_v20  ;;  %v5977_v57 = vld [vmem:[#allocation5 + $0x5c0] ss:$48 sps:$4 sm:$0xff]  }
  0xc6   :  { %1978 = vmatpush1.bf16.msra.mxu1 %v5811_v43  ;;  %2233 = vmatprep.subr.bf16.mxu0 %v5895_v58  ;;  %v5902_v43 = vld [vmem:[#allocation5 + $0x668] ss:$48 sps:$4 sm:$0xff]   ;;  %v5985_v58 = vld [vmem:[#allocation5 + $0x624] ss:$48 sps:$4 sm:$0xff]  }
  0xc7   :  { %1979 = vmatprep.subr.bf16.mxu1 %v5819_v44  ;;  %v5910_v44 = vld [vmem:[#allocation5 + $0x6cc] ss:$48 sps:$4 sm:$0xff]  }
  0xc9   :  { %2234 = vmatpush1.bf16.msra.mxu0 %v5893_v62  ;;  %v5983_v62 = vld [vmem:[#allocation5 + $0x620] ss:$48 sps:$4 sm:$0xff]  }
  0xca   :  { %1980 = vmatpush1.bf16.msra.mxu1 %v5817_v47  ;;  %2235 = vmatprep.subr.bf16.mxu0 %v5901_v63  ;;  %v5908_v47 = vld [vmem:[#allocation5 + $0x6c8] ss:$48 sps:$4 sm:$0xff]   ;;  %v5991_v63 = vld [vmem:[#allocation5 + $0x684] ss:$48 sps:$4 sm:$0xff]  }
  0xcb   :  { %1981 = vmatprep.subr.bf16.mxu1 %v5825_v48  ;;  %v5916_v48 = vld [vmem:[#allocation5 + $0x72c] ss:$48 sps:$4 sm:$0xff]  }
  0xcd   :  { %2236 = vmatpush1.bf16.msra.mxu0 %v5899_v2  ;;  %v5989_v2 = vld [vmem:[#allocation5 + $0x680] ss:$48 sps:$4 sm:$0xff]  }
  0xce   :  { %1982 = vmatpush1.bf16.msra.mxu1 %v5823_v51  ;;  %2237 = vmatprep.subr.bf16.mxu0 %v5907_v4  ;;  %v5914_v51 = vld [vmem:[#allocation5 + $0x728] ss:$48 sps:$4 sm:$0xff]   ;;  %v5997_v4 = vld [vmem:[#allocation5 + $0x6e4] ss:$48 sps:$4 sm:$0xff]  }
  0xcf   :  { %1983 = vmatprep.subr.bf16.mxu1 %v5831_v52  ;;  %v5922_v52 = vld [vmem:[#allocation5 + $0x78c] ss:$48 sps:$4 sm:$0xff]  }
  0xd1   :  { %2238 = vmatpush1.bf16.msra.mxu0 %v5905_v7  ;;  %v5995_v7 = vld [vmem:[#allocation5 + $0x6e0] ss:$48 sps:$4 sm:$0xff]  }
  0xd2   :  { %1984 = vmatpush1.bf16.msra.mxu1 %v5829_v55  ;;  %2239 = vmatprep.subr.bf16.mxu0 %v5913_v8  ;;  %v5920_v55 = vld [vmem:[#allocation5 + $0x788] ss:$48 sps:$4 sm:$0xff]   ;;  %v6003_v8 = vld [vmem:[#allocation5 + $0x744] ss:$48 sps:$4 sm:$0xff]  }
  0xd3   :  { %1985 = vmatprep.subr.bf16.mxu1 %v5837_v56  ;;  %v5928_v56 = vld [vmem:[#allocation5 + $0x7ec] ss:$48 sps:$4 sm:$0xff]  }
  0xd5   :  { %2240 = vmatpush1.bf16.msra.mxu0 %v5911_v11  ;;  %v6001_v11 = vld [vmem:[#allocation5 + $0x740] ss:$48 sps:$4 sm:$0xff]  }
  0xd6   :  { %1986 = vmatpush1.bf16.msra.mxu1 %v5835_v59  ;;  %2241 = vmatprep.subr.bf16.mxu0 %v5919_v12  ;;  %v5926_v59 = vld [vmem:[#allocation5 + $0x7e8] ss:$48 sps:$4 sm:$0xff]   ;;  %v6009_v12 = vld [vmem:[#allocation5 + $0x7a4] ss:$48 sps:$4 sm:$0xff]  }
  0xd7   :  { %1987 = vmatprep.subr.bf16.mxu1 %v5844_v60  ;;  %v5934_v60 = vld [vmem:[#allocation5 + $0x84c] ss:$48 sps:$4 sm:$0xff]  }
  0xd9   :  { %2242 = vmatpush1.bf16.msra.mxu0 %v5917_v15  ;;  %v6007_v15 = vld [vmem:[#allocation5 + $0x7a0] ss:$48 sps:$4 sm:$0xff]  }
  0xda   :  { %1988 = vmatpush1.bf16.msra.mxu1 %v5842_v0  ;;  %2243 = vmatprep.subr.bf16.mxu0 %v5925_v16  ;;  %v5932_v0 = vld [vmem:[#allocation5 + $0x848] ss:$48 sps:$4 sm:$0xff]   ;;  %v6015_v16 = vld [vmem:[#allocation5 + $0x804] ss:$48 sps:$4 sm:$0xff]  }
  0xdb   :  { %1989 = vmatprep.subr.bf16.mxu1 %v5850_v1  ;;  %v5940_v1 = vld [vmem:[#allocation5 + $0x8ac] ss:$48 sps:$4 sm:$0xff]  }
  0xdd   :  { %2244 = vmatpush1.bf16.msra.mxu0 %v5923_v19  ;;  %v6013_v19 = vld [vmem:[#allocation5 + $0x800] ss:$48 sps:$4 sm:$0xff]  }
  0xde   :  { %1990 = vmatpush1.bf16.msra.mxu1 %v5848_v5  ;;  %2245 = vmatprep.subr.bf16.mxu0 %v5931_v21  ;;  %v5938_v5 = vld [vmem:[#allocation5 + $0x8a8] ss:$48 sps:$4 sm:$0xff]   ;;  %v6021_v21 = vld [vmem:[#allocation5 + $0x864] ss:$48 sps:$4 sm:$0xff]  }
  0xdf   :  { %1991 = vmatprep.subr.bf16.mxu1 %v5856_v6  ;;  %v5946_v6 = vld [vmem:[#allocation5 + $0x1c] ss:$48 sps:$4 sm:$0xff]  }
  0xe1   :  { %2246 = vmatpush1.bf16.msra.mxu0 %v5929_v24  ;;  %v6019_v24 = vld [vmem:[#allocation5 + $0x860] ss:$48 sps:$4 sm:$0xff]  }
  0xe2   :  { %1992 = vmatpush1.bf16.msra.mxu1 %v5854_v9  ;;  %2247 = vmatprep.subr.bf16.mxu0 %v5937_v25  ;;  %v5944_v9 = vld [vmem:[#allocation5 + $0x18] ss:$48 sps:$4 sm:$0xff]   ;;  %v6027_v25 = vld [vmem:[#allocation5 + $0x8c4] ss:$48 sps:$4 sm:$0xff]  }
  0xe3   :  { %1993 = vmatprep.subr.bf16.mxu1 %v5862_v10  ;;  %v5952_v10 = vld [vmem:[#allocation5 + $0x7c] ss:$48 sps:$4 sm:$0xff]  }
  0xe5   :  { %2248 = vmatpush1.bf16.msra.mxu0 %v5935_v28  ;;  %v6025_v28 = vld [vmem:[#allocation5 + $0x8c0] ss:$48 sps:$4 sm:$0xff]  }
  0xe6   :  { %1994 = vmatpush1.bf16.msra.mxu1 %v5860_v13  ;;  %2249 = vmatprep.subr.bf16.mxu0 %v5943_v29  ;;  %v5950_v13 = vld [vmem:[#allocation5 + $0x78] ss:$48 sps:$4 sm:$0xff]   ;;  %v6036_v29 = vld [vmem:[#allocation8 + $0x4] ss:$12 sps:$4 sm:$0xff]  }
  0xe7   :  { %1995 = vmatprep.subr.bf16.mxu1 %v5868_v14  ;;  %v5958_v14 = vld [vmem:[#allocation5 + $0xdc] ss:$48 sps:$4 sm:$0xff]  }
  0xe9   :  { %2250 = vmatpush1.bf16.msra.mxu0 %v5941_v32  ;;  %v6034_v32 = vld [vmem:[#allocation8] ss:$12 sps:$4 sm:$0xff]  }
  0xea   :  { %1996 = vmatpush1.bf16.msra.mxu1 %v5866_v17  ;;  %2251 = vmatprep.subr.bf16.mxu0 %v5949_v33  ;;  %v5956_v17 = vld [vmem:[#allocation5 + $0xd8] ss:$48 sps:$4 sm:$0xff]  }
  0xeb   :  { %1997 = vmatprep.subr.bf16.mxu1 %v5874_v18  ;;  %v5964_v18 = vld [vmem:[#allocation5 + $0x13c] ss:$48 sps:$4 sm:$0xff]   ;;  %v6042_v33 = vld [vmem:[#allocation8 + $0x1c] ss:$12 sps:$4 sm:$0xff]  }
  0xed   :  { %2252 = vmatpush1.bf16.msra.mxu0 %v5947_v37  ;;  %v6040_v37 = vld [vmem:[#allocation8 + $0x18] ss:$12 sps:$4 sm:$0xff]  }
  0xee   :  { %1998 = vmatpush1.bf16.msra.mxu1 %v5872_v22  ;;  %2253 = vmatprep.subr.bf16.mxu0 %v5955_v38  ;;  %v5962_v22 = vld [vmem:[#allocation5 + $0x138] ss:$48 sps:$4 sm:$0xff]   ;;  %v6048_v38 = vld [vmem:[#allocation8 + $0x34] ss:$12 sps:$4 sm:$0xff]  }
  0xef   :  { %1999 = vmatprep.subr.bf16.mxu1 %v5880_v23  ;;  %v5970_v23 = vld [vmem:[#allocation5 + $0x19c] ss:$48 sps:$4 sm:$0xff]  }
  0xf1   :  { %2254 = vmatpush1.bf16.msra.mxu0 %v5953_v41  ;;  %v6046_v41 = vld [vmem:[#allocation8 + $0x30] ss:$12 sps:$4 sm:$0xff]  }
  0xf2   :  { %2000 = vmatpush1.bf16.msra.mxu1 %v5878_v26  ;;  %2255 = vmatprep.subr.bf16.mxu0 %v5961_v42  ;;  %v5968_v26 = vld [vmem:[#allocation5 + $0x198] ss:$48 sps:$4 sm:$0xff]  }
  0xf3   :  { %2001 = vmatprep.subr.bf16.mxu1 %v5886_v27  ;;  %v5976_v27 = vld [vmem:[#allocation5 + $0x1fc] ss:$48 sps:$4 sm:$0xff]   ;;  %v6054_v42 = vld [vmem:[#allocation8 + $0x4c] ss:$12 sps:$4 sm:$0xff]  }
  0xf5   :  { %2256 = vmatpush1.bf16.msra.mxu0 %v5959_v45  ;;  %v6052_v45 = vld [vmem:[#allocation8 + $0x48] ss:$12 sps:$4 sm:$0xff]  }
  0xf6   :  { %2002 = vmatpush1.bf16.msra.mxu1 %v5884_v30  ;;  %2257 = vmatprep.subr.bf16.mxu0 %v5967_v46  ;;  %v5974_v30 = vld [vmem:[#allocation5 + $0x1f8] ss:$48 sps:$4 sm:$0xff]   ;;  %v6060_v46 = vld [vmem:[#allocation8 + $0x64] ss:$12 sps:$4 sm:$0xff]  }
  0xf7   :  { %2003 = vmatprep.subr.bf16.mxu1 %v5892_v31  ;;  %v5982_v31 = vld [vmem:[#allocation5 + $0x25c] ss:$48 sps:$4 sm:$0xff]  }
  0xf9   :  { %2258 = vmatpush1.bf16.msra.mxu0 %v5965_v49  ;;  %v6058_v49 = vld [vmem:[#allocation8 + $0x60] ss:$12 sps:$4 sm:$0xff]  }
  0xfa   :  { %2004 = vmatpush1.bf16.msra.mxu1 %v5890_v35  ;;  %2259 = vmatprep.subr.bf16.mxu0 %v5973_v50  ;;  %v5980_v35 = vld [vmem:[#allocation5 + $0x258] ss:$48 sps:$4 sm:$0xff]  }
  0xfb   :  { %2016 = vmatprep.subr.bf16.mxu1 %v5898_v36  ;;  %v5988_v36 = vld [vmem:[#allocation5 + $0x2bc] ss:$48 sps:$4 sm:$0xff]   ;;  %v6066_v50 = vld [vmem:[#allocation8 + $0x7c] ss:$12 sps:$4 sm:$0xff]  }
  0xfd   :  { %2006 = vmatmul.mubr.bf16.vlgmr.msra.gmra.mrb[4].mxu1 %v6765_v61  ;;  %2260 = vmatpush1.bf16.msra.mxu0 %v5971_v53  ;;  %v6064_v53 = vld [vmem:[#allocation8 + $0x78] ss:$12 sps:$4 sm:$0xff]  }
  0xfe   :  { %2017 = vmatpush1.bf16.msra.mxu1 %v5896_v39  ;;  %2048 = vmatprep.mubr.bf16.mxu1 %v6666_v3  ;;  %v5986_v39 = vld [vmem:[#allocation5 + $0x2b8] ss:$48 sps:$4 sm:$0xff]  }
  0xff   :  { %2018 = vmatprep.subr.bf16.mxu1 %v5904_v40  ;;  %2261 = vmatprep.subr.bf16.mxu0 %v5979_v54  ;;  %v5994_v40 = vld [vmem:[#allocation5 + $0x31c] ss:$48 sps:$4 sm:$0xff]  }
 0x100   :  { %v6072_v54 = vld [vmem:[#allocation8 + $0x94] ss:$12 sps:$4 sm:$0xff]  }
 0x101   :  { %2262 = vmatpush1.bf16.msra.mxu0 %v5977_v57  ;;  %v6070_v57 = vld [vmem:[#allocation8 + $0x90] ss:$12 sps:$4 sm:$0xff]  }
 0x102   :  { %2019 = vmatpush1.bf16.msra.mxu1 %v5902_v43  ;;  %2274 = vmatprep.subr.bf16.mxu0 %v5985_v58  ;;  %v5992_v43 = vld [vmem:[#allocation5 + $0x318] ss:$48 sps:$4 sm:$0xff]  }
 0x103   :  { %2020 = vmatprep.subr.bf16.mxu1 %v5910_v44  ;;  %v6000_v44 = vld [vmem:[#allocation5 + $0x37c] ss:$48 sps:$4 sm:$0xff]   ;;  %v6078_v58 = vld [vmem:[#allocation8 + $0xac] ss:$12 sps:$4 sm:$0xff]  }
 0x104   :  { %2264 = vmatmul.mubr.bf16.vlgmr.msra.gmra.mrb[4].mxu0 %v6765_v61 }
 0x105   :  { %2275 = vmatpush1.bf16.msra.mxu0 %v5983_v62  ;;  %2306 = vmatprep.mubr.bf16.mxu0 %v6666_v3  ;;  %v6076_v62 = vld [vmem:[#allocation8 + $0xa8] ss:$12 sps:$4 sm:$0xff]  }
 0x106   :  { %2021 = vmatpush1.bf16.msra.mxu1 %v5908_v47  ;;  %2276 = vmatprep.subr.bf16.mxu0 %v5991_v63  ;;  %v5998_v47 = vld [vmem:[#allocation5 + $0x378] ss:$48 sps:$4 sm:$0xff]   ;;  %v6084_v63 = vld [vmem:[#allocation8 + $0xc4] ss:$12 sps:$4 sm:$0xff]  }
 0x107   :  { %2022 = vmatprep.subr.bf16.mxu1 %v5916_v48  ;;  %v6006_v48 = vld [vmem:[#allocation5 + $0x3dc] ss:$48 sps:$4 sm:$0xff]  }
 0x109   :  { %2277 = vmatpush1.bf16.msra.mxu0 %v5989_v2  ;;  %v6082_v2 = vld [vmem:[#allocation8 + $0xc0] ss:$12 sps:$4 sm:$0xff]  }
 0x10a   :  { %2023 = vmatpush1.bf16.msra.mxu1 %v5914_v51  ;;  %2278 = vmatprep.subr.bf16.mxu0 %v5997_v4  ;;  %v6004_v51 = vld [vmem:[#allocation5 + $0x3d8] ss:$48 sps:$4 sm:$0xff]  }
 0x10b   :  { %2024 = vmatprep.subr.bf16.mxu1 %v5922_v52  ;;  %v6012_v52 = vld [vmem:[#allocation5 + $0x43c] ss:$48 sps:$4 sm:$0xff]   ;;  %v6090_v4 = vld [vmem:[#allocation8 + $0xdc] ss:$12 sps:$4 sm:$0xff]  }
 0x10d   :  { %2279 = vmatpush1.bf16.msra.mxu0 %v5995_v7  ;;  %v6088_v7 = vld [vmem:[#allocation8 + $0xd8] ss:$12 sps:$4 sm:$0xff]  }
 0x10e   :  { %2025 = vmatpush1.bf16.msra.mxu1 %v5920_v55  ;;  %2280 = vmatprep.subr.bf16.mxu0 %v6003_v8  ;;  %v6010_v55 = vld [vmem:[#allocation5 + $0x438] ss:$48 sps:$4 sm:$0xff]   ;;  %v6096_v8 = vld [vmem:[#allocation8 + $0xf4] ss:$12 sps:$4 sm:$0xff]  }
 0x10f   :  { %2026 = vmatprep.subr.bf16.mxu1 %v5928_v56  ;;  %v6018_v56 = vld [vmem:[#allocation5 + $0x49c] ss:$48 sps:$4 sm:$0xff]  }
 0x111   :  { %2281 = vmatpush1.bf16.msra.mxu0 %v6001_v11  ;;  %v6094_v11 = vld [vmem:[#allocation8 + $0xf0] ss:$12 sps:$4 sm:$0xff]  }
 0x112   :  { %2027 = vmatpush1.bf16.msra.mxu1 %v5926_v59  ;;  %2282 = vmatprep.subr.bf16.mxu0 %v6009_v12  ;;  %v6016_v59 = vld [vmem:[#allocation5 + $0x498] ss:$48 sps:$4 sm:$0xff]  }
 0x113   :  { %2028 = vmatprep.subr.bf16.mxu1 %v5934_v60  ;;  %v6024_v60 = vld [vmem:[#allocation5 + $0x4fc] ss:$48 sps:$4 sm:$0xff]   ;;  %v6037_v12 = vld [vmem:[#allocation5 + $0x618] ss:$48 sps:$4 sm:$0xff]  }
 0x115   :  { %2283 = vmatpush1.bf16.msra.mxu0 %v6007_v15  ;;  %v6100_v15 = vld [vmem:[#allocation8 + $0x108] ss:$12 sps:$4 sm:$0xff]  }
 0x116   :  { %2029 = vmatpush1.bf16.msra.mxu1 %v5932_v0  ;;  %2284 = vmatprep.subr.bf16.mxu0 %v6015_v16  ;;  %v6022_v0 = vld [vmem:[#allocation5 + $0x4f8] ss:$48 sps:$4 sm:$0xff]   ;;  %v6108_v16 = vld [vmem:[#allocation8 + $0x124] ss:$12 sps:$4 sm:$0xff]  }
 0x117   :  { %2030 = vmatprep.subr.bf16.mxu1 %v5940_v1  ;;  %v6030_v1 = vld [vmem:[#allocation5 + $0x55c] ss:$48 sps:$4 sm:$0xff]  }
 0x119   :  { %2285 = vmatpush1.bf16.msra.mxu0 %v6013_v19  ;;  %v6106_v19 = vld [vmem:[#allocation8 + $0x120] ss:$12 sps:$4 sm:$0xff]  }
 0x11a   :  { %2031 = vmatpush1.bf16.msra.mxu1 %v5938_v5  ;;  %2286 = vmatprep.subr.bf16.mxu0 %v6021_v21  ;;  %v6028_v5 = vld [vmem:[#allocation5 + $0x558] ss:$48 sps:$4 sm:$0xff]  }
 0x11b   :  { %2145 = vmatprep.subr.bf16.mxu1 %v5946_v6  ;;  %v6033_v6 = vld [vmem:[#allocation5 + $0x5bc] ss:$48 sps:$4 sm:$0xff]   ;;  %v6114_v21 = vld [vmem:[#allocation8 + $0x13c] ss:$12 sps:$4 sm:$0xff]  }
 0x11d   :  { %2049 = vmatmul.mubr.bf16.vlgmr.msra.gmra.mrb[4].mxu1 %v6771_v34  ;;  %2287 = vmatpush1.bf16.msra.mxu0 %v6019_v24  ;;  %v6112_v24 = vld [vmem:[#allocation8 + $0x138] ss:$12 sps:$4 sm:$0xff]  }
 0x11e   :  { %2146 = vmatpush1.bf16.msra.mxu1 %v5944_v9  ;;  %2177 = vmatprep.mubr.bf16.mxu1 %v6761_v20  ;;  %v6031_v9 = vld [vmem:[#allocation5 + $0x5b8] ss:$48 sps:$4 sm:$0xff]  }
 0x11f   :  { %2147 = vmatprep.subr.bf16.mxu1 %v5952_v10  ;;  %2288 = vmatprep.subr.bf16.mxu0 %v6027_v25  ;;  %v6039_v10 = vld [vmem:[#allocation5 + $0x61c] ss:$48 sps:$4 sm:$0xff]  }
 0x120   :  { %v6120_v25 = vld [vmem:[#allocation8 + $0x154] ss:$12 sps:$4 sm:$0xff]  }
 0x121   :  { %2289 = vmatpush1.bf16.msra.mxu0 %v6025_v28  ;;  %v6118_v28 = vld [vmem:[#allocation8 + $0x150] ss:$12 sps:$4 sm:$0xff]  }
 0x122   :  { %2148 = vmatpush1.bf16.msra.mxu1 %v5950_v13  ;;  %4376 = vmatprep.subr.bf16.mxu0 %v6036_v29  ;;  %v6102_v13 = vld [vmem:[#allocation8 + $0x10c] ss:$12 sps:$4 sm:$0xff]  }
 0x123   :  { %2149 = vmatprep.subr.bf16.mxu1 %v5958_v14  ;;  %v6045_v14 = vld [vmem:[#allocation5 + $0x67c] ss:$48 sps:$4 sm:$0xff]   ;;  %v6126_v29 = vld [vmem:[#allocation8 + $0x16c] ss:$12 sps:$4 sm:$0xff]  }
 0x124   :  { %2307 = vmatmul.mubr.bf16.vlgmr.msra.gmra.mrb[4].mxu0 %v6771_v34 }
 0x125   :  { %4377 = vmatpush1.bf16.msra.mxu0 %v6034_v32  ;;  %v6124_v32 = vld [vmem:[#allocation8 + $0x168] ss:$12 sps:$4 sm:$0xff]  }
 0x126   :  { %2150 = vmatpush1.bf16.msra.mxu1 %v5956_v17  ;;  %4378 = vmatprep.subr.bf16.mxu0 %v6042_v33  ;;  %v6043_v17 = vld [vmem:[#allocation5 + $0x678] ss:$48 sps:$4 sm:$0xff]   ;;  %v6156_v33 = vld [vmem:[#allocation8 + $0x184] ss:$12 sps:$4 sm:$0xff]  }
 0x127   :  { %2151 = vmatprep.subr.bf16.mxu1 %v5964_v18  ;;  %v6051_v18 = vld [vmem:[#allocation5 + $0x6dc] ss:$48 sps:$4 sm:$0xff]  }
 0x129   :  { %4379 = vmatpush1.bf16.msra.mxu0 %v6040_v37  ;;  %v6073_v37 = vld [vmem:[#allocation5 + $0x858] ss:$48 sps:$4 sm:$0xff]  }
 0x12a   :  { %2152 = vmatpush1.bf16.msra.mxu1 %v5962_v22  ;;  %4380 = vmatprep.subr.bf16.mxu0 %v6048_v38  ;;  %v6049_v22 = vld [vmem:[#allocation5 + $0x6d8] ss:$48 sps:$4 sm:$0xff]   ;;  %v6081_v38 = vld [vmem:[#allocation5 + $0x8bc] ss:$48 sps:$4 sm:$0xff]  }
 0x12b   :  { %2153 = vmatprep.subr.bf16.mxu1 %v5970_v23  ;;  %v6057_v23 = vld [vmem:[#allocation5 + $0x73c] ss:$48 sps:$4 sm:$0xff]  }
 0x12d   :  { %4381 = vmatpush1.bf16.msra.mxu0 %v6046_v41  ;;  %v6085_v41 = vld [vmem:[#allocation5 + $0x28] ss:$48 sps:$4 sm:$0xff]  }
 0x12e   :  { %2154 = vmatpush1.bf16.msra.mxu1 %v5968_v26  ;;  %4382 = vmatprep.subr.bf16.mxu0 %v6054_v42  ;;  %v6055_v26 = vld [vmem:[#allocation5 + $0x738] ss:$48 sps:$4 sm:$0xff]   ;;  %v6093_v42 = vld [vmem:[#allocation5 + $0x8c] ss:$48 sps:$4 sm:$0xff]  }
 0x12f   :  { %2155 = vmatprep.subr.bf16.mxu1 %v5976_v27  ;;  %v6063_v27 = vld [vmem:[#allocation5 + $0x79c] ss:$48 sps:$4 sm:$0xff]  }
 0x131   :  { %4383 = vmatpush1.bf16.msra.mxu0 %v6052_v45  ;;  %v6097_v45 = vld [vmem:[#allocation5 + $0xe8] ss:$48 sps:$4 sm:$0xff]  }
 0x132   :  { %2156 = vmatpush1.bf16.msra.mxu1 %v5974_v30  ;;  %4384 = vmatprep.subr.bf16.mxu0 %v6060_v46  ;;  %v6061_v30 = vld [vmem:[#allocation5 + $0x798] ss:$48 sps:$4 sm:$0xff]   ;;  %v387_v46 = vlaneseq }
 0x133   :  { %2157 = vmatprep.subr.bf16.mxu1 %v5982_v31  ;;  %v6069_v31 = vld [vmem:[#allocation5 + $0x7fc] ss:$48 sps:$4 sm:$0xff]  }
 0x135   :  { %4385 = vmatpush1.bf16.msra.mxu0 %v6058_v49  ;;  %v6788_v49 = vshrl.u32 %v387_v46, 7  ;;  %v6142_v46 = vld [vmem:[#allocation5 + $0x4a8] ss:$48 sps:$4 sm:$0xff]  }
 0x136   :  { %2158 = vmatpush1.bf16.msra.mxu1 %v5980_v35  ;;  %4386 = vmatprep.subr.bf16.mxu0 %v6066_v50  ;;  %v6067_v35 = vld [vmem:[#allocation5 + $0x7f8] ss:$48 sps:$4 sm:$0xff]   ;;  %v6111_v50 = vld [vmem:[#allocation5 + $0x1ac] ss:$48 sps:$4 sm:$0xff]  }
 0x137   :  { %2159 = vmatprep.subr.bf16.mxu1 %v5988_v36  ;;  %v6075_v36 = vld [vmem:[#allocation5 + $0x85c] ss:$48 sps:$4 sm:$0xff]  }
 0x139   :  { %4387 = vmatpush1.bf16.msra.mxu0 %v6064_v53  ;;  %v6793_v53 = vsub.s32 0, %v6788_v49 }
 0x13a   :  { %2160 = vmatpush1.bf16.msra.mxu1 %v5986_v39  ;;  %4388 = vmatprep.subr.bf16.mxu0 %v6072_v54  ;;  %v6079_v39 = vld [vmem:[#allocation5 + $0x8b8] ss:$48 sps:$4 sm:$0xff]   ;;  %v6117_v54 = vld [vmem:[#allocation5 + $0x20c] ss:$48 sps:$4 sm:$0xff]  }
 0x13b   :  { %2161 = vmatprep.subr.bf16.mxu1 %v5994_v40  ;;  %v6087_v40 = vld [vmem:[#allocation5 + $0x2c] ss:$48 sps:$4 sm:$0xff]  }
 0x13d   :  { %4389 = vmatpush1.bf16.msra.mxu0 %v6070_v57  ;;  %v6123_v57 = vld [vmem:[#allocation5 + $0x26c] ss:$48 sps:$4 sm:$0xff]  }
 0x13e   :  { %2162 = vmatpush1.bf16.msra.mxu1 %v5992_v43  ;;  %4390 = vmatprep.subr.bf16.mxu0 %v6078_v58  ;;  %v6091_v43 = vld [vmem:[#allocation5 + $0x88] ss:$48 sps:$4 sm:$0xff]  }
 0x13f   :  { %2163 = vmatprep.subr.bf16.mxu1 %v6000_v44  ;;  %v6099_v44 = vld [vmem:[#allocation5 + $0xec] ss:$48 sps:$4 sm:$0xff]  }
 0x141   :  { %4391 = vmatpush1.bf16.msra.mxu0 %v6076_v62 }
 0x142   :  { %2164 = vmatpush1.bf16.msra.mxu1 %v5998_v47  ;;  %4392 = vmatprep.subr.bf16.mxu0 %v6084_v63  ;;  %v6105_v47 = vld [vmem:[#allocation5 + $0x14c] ss:$48 sps:$4 sm:$0xff]   ;;  %v6121_v63 = vld [vmem:[#allocation5 + $0x268] ss:$48 sps:$4 sm:$0xff]  }
 0x143   :  { %2165 = vmatprep.subr.bf16.mxu1 %v6006_v48  ;;  %v6103_v48 = vld [vmem:[#allocation5 + $0x148] ss:$48 sps:$4 sm:$0xff]  }
 0x145   :  { %4393 = vmatpush1.bf16.msra.mxu0 %v6082_v2 }
 0x146   :  { %2166 = vmatpush1.bf16.msra.mxu1 %v6004_v51  ;;  %4394 = vmatprep.subr.bf16.mxu0 %v6090_v4  ;;  %v6109_v51 = vld [vmem:[#allocation5 + $0x1a8] ss:$48 sps:$4 sm:$0xff]  }
 0x147   :  { %2167 = vmatprep.subr.bf16.mxu1 %v6012_v52  ;;  %v6790_v52 = vld [vmem:[#allocation7] sm:$0xff] }
 0x149   :  { %4395 = vmatpush1.bf16.msra.mxu0 %v6088_v7  ;;  %v6127_v7 = vld [vmem:[#allocation5 + $0x2c8] ss:$48 sps:$4 sm:$0xff]  }
 0x14a   :  { %2168 = vmatpush1.bf16.msra.mxu1 %v6010_v55  ;;  %4396 = vmatprep.subr.bf16.mxu0 %v6096_v8  ;;  %v6115_v55 = vld [vmem:[#allocation5 + $0x208] ss:$48 sps:$4 sm:$0xff]  }
 0x14b   :  { %2169 = vmatprep.subr.bf16.mxu1 %v6018_v56  ;;  %v390_v56 = vrot.slane %v6790_v52, %v6793_v53 }
 0x14d   :  { %4397 = vmatpush1.bf16.msra.mxu0 %v6094_v11  ;;  %v6132_v11 = vld [vmem:[#allocation5 + $0x32c] ss:$48 sps:$4 sm:$0xff]  }
 0x14e   :  { %2170 = vmatpush1.bf16.msra.mxu1 %v6016_v59  ;;  %4398 = vmatprep.subr.bf16.mxu0 %v6102_v13 }
 0x14f   :  { %2171 = vmatprep.subr.bf16.mxu1 %v6024_v60 }
 0x151   :  { %4399 = vmatpush1.bf16.msra.mxu0 %v6100_v15  ;;  %v6130_v15 = vld [vmem:[#allocation5 + $0x328] ss:$48 sps:$4 sm:$0xff]  }
 0x152   :  { %2172 = vmatpush1.bf16.msra.mxu1 %v6022_v0  ;;  %4400 = vmatprep.subr.bf16.mxu0 %v6108_v16  ;;  %v6129_v0 = vld [vmem:[#allocation5 + $0x2cc] ss:$48 sps:$4 sm:$0xff]  }
 0x153   :  { %2173 = vmatprep.subr.bf16.mxu1 %v6030_v1  ;;  %v6154_v16 = vld [vmem:[#allocation8 + $0x180] ss:$12 sps:$4 sm:$0xff]  }
 0x155   :  { %4401 = vmatpush1.bf16.msra.mxu0 %v6106_v19  ;;  %v6160_v19 = vld [vmem:[#allocation8 + $0x198] ss:$12 sps:$4 sm:$0xff]  }
 0x156   :  { %2174 = vmatpush1.bf16.msra.mxu1 %v6028_v5  ;;  %4402 = vmatprep.subr.bf16.mxu0 %v6114_v21  ;;  %v6133_v21 = vld [vmem:[#allocation5 + $0x388] ss:$48 sps:$4 sm:$0xff]  }
 0x157   :  { %2175 = vmatprep.subr.bf16.mxu1 %v6033_v6 }
 0x159   :  { %4403 = vmatpush1.bf16.msra.mxu0 %v6112_v24  ;;  %v405_v24 = vsub.s32 4, %v6788_v49 }
 0x15a   :  { %2176 = vmatpush1.bf16.msra.mxu1 %v6031_v9  ;;  %4404 = vmatprep.subr.bf16.mxu0 %v6120_v25  ;;  %v409_v25 = vsub.s32 5, %v6788_v49 }
 0x15b   :  { %2188 = vmatprep.subr.bf16.mxu1 %v6039_v10 }
 0x15d   :  { %2178 = vmatmul.mubr.bf16.vlgmr.msra.gmra.mrb[8].mxu1 %v6765_v61  ;;  %4405 = vmatpush1.bf16.msra.mxu0 %v6118_v28  ;;  %v6141_v28 = vld [vmem:[#allocation5 + $0x44c] ss:$48 sps:$4 sm:$0xff]  }
 0x15e   :  { %2189 = vmatpush1.bf16.msra.mxu1 %v6037_v12  ;;  %2220 = vmatprep.mubr.bf16.mxu1 %v6666_v3 }
 0x15f   :  { %2190 = vmatprep.subr.bf16.mxu1 %v6045_v14  ;;  %4406 = vmatprep.subr.bf16.mxu0 %v6126_v29  ;;  %v6174_v29 = vld [vmem:[#allocation8 + $0x1cc] ss:$12 sps:$4 sm:$0xff]  }
 0x161   :  { %4407 = vmatpush1.bf16.msra.mxu0 %v6124_v32  ;;  %v6139_v32 = vld [vmem:[#allocation5 + $0x448] ss:$48 sps:$4 sm:$0xff]  }
 0x162   :  { %2191 = vmatpush1.bf16.msra.mxu1 %v6043_v17  ;;  %4419 = vmatprep.subr.bf16.mxu0 %v6156_v33  ;;  %v6135_v17 = vld [vmem:[#allocation5 + $0x38c] ss:$48 sps:$4 sm:$0xff]   ;;  %v6172_v33 = vld [vmem:[#allocation8 + $0x1c8] ss:$12 sps:$4 sm:$0xff]  }
 0x163   :  { %2192 = vmatprep.subr.bf16.mxu1 %v6051_v18  ;;  %v6162_v18 = vld [vmem:[#allocation8 + $0x19c] ss:$12 sps:$4 sm:$0xff]  }
 0x166   :  { %2193 = vmatpush1.bf16.msra.mxu1 %v6049_v22  ;;  %v6138_v22 = vld [vmem:[#allocation5 + $0x3ec] ss:$48 sps:$4 sm:$0xff]  }
 0x167   :  { %2194 = vmatprep.subr.bf16.mxu1 %v6057_v23  ;;  %v6168_v23 = vld [vmem:[#allocation8 + $0x1b4] ss:$12 sps:$4 sm:$0xff]  }
 0x16a   :  { %2195 = vmatpush1.bf16.msra.mxu1 %v6055_v26  ;;  %v6136_v26 = vld [vmem:[#allocation5 + $0x3e8] ss:$48 sps:$4 sm:$0xff]  }
 0x16b   :  { %2196 = vmatprep.subr.bf16.mxu1 %v6063_v27  ;;  %v6166_v27 = vld [vmem:[#allocation8 + $0x1b0] ss:$12 sps:$4 sm:$0xff]  }
 0x16e   :  { %2197 = vmatpush1.bf16.msra.mxu1 %v6061_v30  ;;  %v406_v30 = vrot.slane %v6790_v52, %v405_v24  ;;  %v6216_v24 = vld [vmem:[#allocation8 + $0x288] ss:$12 sps:$4 sm:$0xff]  }
 0x16f   :  { %2198 = vmatprep.subr.bf16.mxu1 %v6069_v31  ;;  %v410_v31 = vrot.slane %v6790_v52, %v409_v25  ;;  %v6223_v25 = vld [vmem:[#allocation8 + $0x2a4] ss:$12 sps:$4 sm:$0xff]  }
 0x172   :  { %2199 = vmatpush1.bf16.msra.mxu1 %v6067_v35  ;;  %v6144_v35 = vld [vmem:[#allocation5 + $0x4ac] ss:$48 sps:$4 sm:$0xff]  }
 0x173   :  { %2200 = vmatprep.subr.bf16.mxu1 %v6075_v36  ;;  %v6180_v36 = vld [vmem:[#allocation8 + $0x1e4] ss:$12 sps:$4 sm:$0xff]  }
 0x176   :  { %2201 = vmatpush1.bf16.msra.mxu1 %v6073_v37 }
 0x177   :  { %2202 = vmatprep.subr.bf16.mxu1 %v6081_v38 }
 0x17a   :  { %2203 = vmatpush1.bf16.msra.mxu1 %v6079_v39 }
 0x17b   :  { %2317 = vmatprep.subr.bf16.mxu1 %v6087_v40 }
 0x17d   :  { %2221 = vmatmul.mubr.bf16.vlgmr.msra.gmra.mrb[8].mxu1 %v6771_v34 }
 0x17e   :  { %2318 = vmatpush1.bf16.msra.mxu1 %v6085_v41  ;;  %2349 = vmatprep.mubr.bf16.mxu1 %v6761_v20  ;;  %v6796_v20 = vsub.s32 1, %v6788_v49 }
 0x17f   :  { %2319 = vmatprep.subr.bf16.mxu1 %v6093_v42  ;;  %v6178_v42 = vld [vmem:[#allocation8 + $0x1e0] ss:$12 sps:$4 sm:$0xff]  }
 0x180   :  { %v394_v58 = vrot.slane %v6790_v52, %v6796_v20 }
 0x182   :  { %2320 = vmatpush1.bf16.msra.mxu1 %v6091_v43 }
 0x183   :  { %2321 = vmatprep.subr.bf16.mxu1 %v6099_v44 }
 0x186   :  { %2322 = vmatpush1.bf16.msra.mxu1 %v6097_v45 }
 0x187   :  { %2323 = vmatprep.subr.bf16.mxu1 %v6105_v47 }
 0x18a   :  { %2324 = vmatpush1.bf16.msra.mxu1 %v6103_v48 }
 0x18b   :  { %2325 = vmatprep.subr.bf16.mxu1 %v6111_v50  ;;  %v6186_v50 = vld [vmem:[#allocation8 + $0x1fc] ss:$12 sps:$4 sm:$0xff]  }
 0x18e   :  { %2326 = vmatpush1.bf16.msra.mxu1 %v6109_v51  ;;  %v6147_v51 = vld [vmem:[#allocation5 + $0x50c] ss:$48 sps:$4 sm:$0xff]  }
 0x18f   :  { %2327 = vmatprep.subr.bf16.mxu1 %v6117_v54 }
 0x190   :  { %v1964_v59 = vpop.f32.mrb[0].mxu1 }
 0x191   :  { %v5613_v60 = vadd.f32 %v1964_v59, %v390_v56  ;;  %v1966_v62 = vpop.f32.mrb[1].mxu1  ;;  %v6150_v59 = vld [vmem:[#allocation5 + $0x56c] ss:$48 sps:$4 sm:$0xff]  }
 0x192   :  { %v5614_v1 = vadd.f32 %v1966_v62, %v394_v58  ;;  %v1968_v2 = vpop.f32.mrb[2].mxu1  ;;  %2328 = vmatpush1.bf16.msra.mxu1 %v6115_v55  ;;  %v6192_v62 = vld [vmem:[#allocation8 + $0x214] ss:$12 sps:$4 sm:$0xff]  }
 0x193   :  { %v5615_v4 = vadd.f32 %v1968_v2, %v390_v56  ;;  %v1970_v5 = vpop.f32.mrb[3].mxu1  ;;  %2329 = vmatprep.subr.bf16.mxu1 %v6123_v57  ;;  %v2403_v8 = vmax.f32 %v5613_v60, 0.0  ;;  %v6145_v56 = vld [vmem:[#allocation5 + $0x508] ss:$48 sps:$4 sm:$0xff]  }
 0x194   :  { %v5616_v6 = vadd.f32 %v1970_v5, %v394_v58  ;;  %v2404_v9 = vmax.f32 %v5614_v1, 0.0  ;;  %v6184_v58 = vld [vmem:[#allocation8 + $0x1f8] ss:$12 sps:$4 sm:$0xff]   ;;  %v6153_v1 = vld [vmem:[#allocation5 + $0x5cc] ss:$48 sps:$4 sm:$0xff]  }
 0x195   :  { %v2415_v10 = vmax.f32 %v5615_v4, 0.0  ;;  %v6198_v2 = vld [vmem:[#allocation8 + $0x22c] ss:$12 sps:$4 sm:$0xff]   ;;  %v6196_v5 = vld [vmem:[#allocation8 + $0x228] ss:$12 sps:$4 sm:$0xff]  }
 0x196   :  { %v2416_v12 = vmax.f32 %v5616_v6, 0.0  ;;  %2330 = vmatpush1.bf16.msra.mxu1 %v6121_v63  ;;  %v6148_v63 = vld [vmem:[#allocation5 + $0x568] ss:$48 sps:$4 sm:$0xff]   ;;  %v6159_v6 = vld [vmem:[#allocation5 + $0x62c] ss:$48 sps:$4 sm:$0xff]  }
 0x197   :  { %v6802_v13 = vpack.c.bf16 %v2415_v10, %v2403_v8  ;;  %2331 = vmatprep.subr.bf16.mxu1 %v6129_v0  ;;  %v2136_v37 = vpop.f32.mrb[0].mxu0  ;;  %v6190_v0 = vld [vmem:[#allocation8 + $0x210] ss:$12 sps:$4 sm:$0xff]   ;;  %v6202_v8 = vld [vmem:[#allocation8 + $0x240] ss:$12 sps:$4 sm:$0xff]  }
 0x198   :  { %v6804_v14 = vpack.c.bf16 %v2416_v12, %v2404_v9  ;;  %v5621_v38 = vadd.f32 %v2136_v37, %v406_v30  ;;  %v2138_v39 = vpop.f32.mrb[1].mxu0  ;;  %v6151_v4 = vld [vmem:[#allocation5 + $0x5c8] ss:$48 sps:$4 sm:$0xff]   ;;  %v6206_v12 = vld [vmem:[#allocation8 + $0x258] ss:$12 sps:$4 sm:$0xff]  }
 0x199   :  { %v5622_v40 = vadd.f32 %v2138_v39, %v410_v31  ;;  %v2140_v41 = vpop.f32.mrb[2].mxu0  ;;  %v6157_v9 = vld [vmem:[#allocation5 + $0x628] ss:$48 sps:$4 sm:$0xff]   ;;  %v6201_v37 = vld [vmem:[#allocation5 + $0x8cc] ss:$48 sps:$4 sm:$0xff]  }
 0x19a   :  { %2332 = vmatpush1.bf16.msra.mxu1 %v6127_v7  ;;  %4408 = vmatprep.mubr.bf16.mxu0 %v6804_v14  ;;  %v2407_v43 = vmax.f32 %v5621_v38, 0.0  ;;  %v5623_v44 = vadd.f32 %v2140_v41, %v406_v30  ;;  %v2142_v45 = vpop.f32.mrb[3].mxu0  ;;  %v6204_v7 = vld [vmem:[#allocation8 + $0x244] ss:$12 sps:$4 sm:$0xff]   ;;  %v6208_v10 = vld [vmem:[#allocation8 + $0x25c] ss:$12 sps:$4 sm:$0xff]  }
 0x19b   :  { %4409 = vmatmul.mubr.bf16.vlgmr.msra.gmra.mrb[8].mxu0 %v6802_v13  ;;  %2333 = vmatprep.subr.bf16.mxu1 %v6132_v11  ;;  %v2408_v47 = vmax.f32 %v5622_v40, 0.0  ;;  %v5624_v48 = vadd.f32 %v2142_v45, %v410_v31  ;;  %v6165_v11 = vld [vmem:[#allocation5 + $0x68c] ss:$48 sps:$4 sm:$0xff]   ;;  %v6226_v30 = vld [vmem:[#allocation8 + $0x2b8] ss:$12 sps:$4 sm:$0xff]  }
 0x19c   :  { %4420 = vmatpush1.bf16.msra.mxu0 %v6154_v16  ;;  %v2419_v54 = vmax.f32 %v5623_v44, 0.0  ;;  %v6171_v16 = vld [vmem:[#allocation5 + $0x6ec] ss:$48 sps:$4 sm:$0xff]   ;;  %v6236_v38 = vld [vmem:[#allocation8 + $0x2e8] ss:$12 sps:$4 sm:$0xff]  }
 0x19d   :  { %4421 = vmatprep.subr.bf16.mxu0 %v6162_v18  ;;  %v2420_v55 = vmax.f32 %v5624_v48, 0.0  ;;  %v6169_v18 = vld [vmem:[#allocation5 + $0x6e8] ss:$48 sps:$4 sm:$0xff]   ;;  %v6195_v31 = vld [vmem:[#allocation5 + $0x86c] ss:$48 sps:$4 sm:$0xff]  }
 0x19e   :  { %2334 = vmatpush1.bf16.msra.mxu1 %v6130_v15  ;;  %v6812_v57 = vpack.c.bf16 %v2419_v54, %v2407_v43  ;;  %v6163_v15 = vld [vmem:[#allocation5 + $0x688] ss:$48 sps:$4 sm:$0xff]   ;;  %v6243_v40 = vld [vmem:[#allocation8 + $0x304] ss:$12 sps:$4 sm:$0xff]   ;;  %v6205_v41 = vld [vmem:[#allocation8 + $0xc8] ss:$12 sps:$4 sm:$0xff]  }
 0x19f   :  { %2335 = vmatprep.subr.bf16.mxu1 %v6135_v17  ;;  %v6814_v60 = vpack.c.bf16 %v2420_v55, %v2408_v47  ;;  %v6213_v17 = vld [vmem:[#allocation8 + $0x274] ss:$12 sps:$4 sm:$0xff]   ;;  %v6199_v39 = vld [vmem:[#allocation5 + $0x8c8] ss:$48 sps:$4 sm:$0xff]   ;;  %v6215_v45 = vld [vmem:[#allocation8 + $0xf8] ss:$12 sps:$4 sm:$0xff]  }
 0x1a0   :  { %4422 = vmatpush1.bf16.msra.mxu0 %v6160_v19  ;;  %v6211_v19 = vld [vmem:[#allocation8 + $0x270] ss:$12 sps:$4 sm:$0xff]   ;;  %v6210_v43 = vld [vmem:[#allocation8 + $0xe0] ss:$12 sps:$4 sm:$0xff]   ;;  %v6229_v54 = vld [vmem:[#allocation8 + $0x68] ss:$12 sps:$4 sm:$0xff]  }
 0x1a1   :  { %4423 = vmatprep.subr.bf16.mxu0 %v6168_v23  ;;  %v6175_v23 = vld [vmem:[#allocation5 + $0x748] ss:$48 sps:$4 sm:$0xff]  }
 0x1a2   :  { %2336 = vmatpush1.bf16.msra.mxu1 %v6133_v21  ;;  %v6177_v21 = vld [vmem:[#allocation5 + $0x74c] ss:$48 sps:$4 sm:$0xff]  }
 0x1a3   :  { %2337 = vmatprep.subr.bf16.mxu1 %v6138_v22  ;;  %v6218_v22 = vld [vmem:[#allocation8 + $0x28c] ss:$12 sps:$4 sm:$0xff]   ;;  %v6220_v47 = vld [vmem:[#allocation8 + $0x110] ss:$12 sps:$4 sm:$0xff]  }
 0x1a4   :  { %4424 = vmatpush1.bf16.msra.mxu0 %v6166_v27  ;;  %v6189_v27 = vld [vmem:[#allocation5 + $0x80c] ss:$48 sps:$4 sm:$0xff]  }
 0x1a5   :  { %4425 = vmatprep.subr.bf16.mxu0 %v6174_v29  ;;  %v6187_v29 = vld [vmem:[#allocation5 + $0x808] ss:$48 sps:$4 sm:$0xff]  }
 0x1a6   :  { %2338 = vmatpush1.bf16.msra.mxu1 %v6136_v26  ;;  %v6181_v26 = vld [vmem:[#allocation5 + $0x7a8] ss:$48 sps:$4 sm:$0xff]  }
 0x1a7   :  { %2339 = vmatprep.subr.bf16.mxu1 %v6141_v28  ;;  %v6228_v28 = vld [vmem:[#allocation8 + $0x2bc] ss:$12 sps:$4 sm:$0xff]   ;;  %v6214_v44 = vld [vmem:[#allocation8 + $0x20] ss:$12 sps:$4 sm:$0xff]  }
 0x1a8   :  { %4426 = vmatpush1.bf16.msra.mxu0 %v6172_v33  ;;  %v6231_v33 = vld [vmem:[#allocation8 + $0x2d0] ss:$12 sps:$4 sm:$0xff]  }
 0x1a9   :  { %4427 = vmatprep.subr.bf16.mxu0 %v6180_v36  ;;  %v6238_v36 = vld [vmem:[#allocation8 + $0x2ec] ss:$12 sps:$4 sm:$0xff]   ;;  %v6224_v48 = vld [vmem:[#allocation8 + $0x50] ss:$12 sps:$4 sm:$0xff]  }
 0x1aa   :  { %2340 = vmatpush1.bf16.msra.mxu1 %v6139_v32  ;;  %v6233_v32 = vld [vmem:[#allocation8 + $0x2d4] ss:$12 sps:$4 sm:$0xff]  }
 0x1ab   :  { %2341 = vmatprep.subr.bf16.mxu1 %v6144_v35  ;;  %v6193_v35 = vld [vmem:[#allocation5 + $0x868] ss:$48 sps:$4 sm:$0xff]  }
 0x1ac   :  { %4428 = vmatpush1.bf16.msra.mxu0 %v6178_v42  ;;  %v6209_v42 = vld [vmem:[#allocation8 + $0x8] ss:$12 sps:$4 sm:$0xff]  }
 0x1ad   :  { %4429 = vmatprep.subr.bf16.mxu0 %v6186_v50  ;;  %v6225_v50 = vld [vmem:[#allocation8 + $0x128] ss:$12 sps:$4 sm:$0xff]  }
 0x1ae   :  { %2342 = vmatpush1.bf16.msra.mxu1 %v6142_v46  ;;  %v6219_v46 = vld [vmem:[#allocation8 + $0x38] ss:$12 sps:$4 sm:$0xff]  }
 0x1af   :  { %2343 = vmatprep.subr.bf16.mxu1 %v6147_v51  ;;  %v6821_v51 = vsub.s32 2, %v6788_v49 }
 0x1b0   :  { %4430 = vmatpush1.bf16.msra.mxu0 %v6184_v58  ;;  %v6234_v58 = vld [vmem:[#allocation8 + $0x80] ss:$12 sps:$4 sm:$0xff]  }
 0x1b1   :  { %4431 = vmatprep.subr.bf16.mxu0 %v6192_v62  ;;  %v398_v55 = vrot.slane %v6790_v52, %v6821_v51 }
 0x1b2   :  { %2344 = vmatpush1.bf16.msra.mxu1 %v6145_v56 }
 0x1b3   :  { %2345 = vmatprep.subr.bf16.mxu1 %v6150_v59  ;;  %v6235_v59 = vld [vmem:[#allocation8 + $0x158] ss:$12 sps:$4 sm:$0xff]  }
 0x1b4   :  { %4432 = vmatpush1.bf16.msra.mxu0 %v6190_v0 }
 0x1b5   :  { %4433 = vmatprep.subr.bf16.mxu0 %v6198_v2 }
 0x1b6   :  { %2346 = vmatpush1.bf16.msra.mxu1 %v6148_v63 }
 0x1b7   :  { %2347 = vmatprep.subr.bf16.mxu1 %v6153_v1 }
 0x1b8   :  { %4434 = vmatpush1.bf16.msra.mxu0 %v6196_v5 }
 0x1b9   :  { %4435 = vmatprep.subr.bf16.mxu0 %v6204_v7  ;;  %v6240_v7 = vld [vmem:[#allocation8 + $0x170] ss:$12 sps:$4 sm:$0xff]  }
 0x1ba   :  { %2348 = vmatpush1.bf16.msra.mxu1 %v6151_v4  ;;  %v6239_v4 = vld [vmem:[#allocation8 + $0x98] ss:$12 sps:$4 sm:$0xff]  }
 0x1bb   :  { %2360 = vmatprep.subr.bf16.mxu1 %v6159_v6 }
 0x1bc   :  { %4436 = vmatpush1.bf16.msra.mxu0 %v6202_v8 }
 0x1bd   :  { %2350 = vmatmul.mubr.bf16.vlgmr.msra.gmra.mrb[12].mxu1 %v6765_v61  ;;  %4437 = vmatprep.subr.bf16.mxu0 %v6208_v10  ;;  %v6183_v61 = vld [vmem:[#allocation5 + $0x7ac] ss:$48 sps:$4 sm:$0xff]  }
 0x1be   :  { %2361 = vmatpush1.bf16.msra.mxu1 %v6157_v9  ;;  %2392 = vmatprep.mubr.bf16.mxu1 %v6666_v3  ;;  %v6221_v3 = vld [vmem:[#allocation8 + $0x2a0] ss:$12 sps:$4 sm:$0xff]  }
 0x1bf   :  { %2362 = vmatprep.subr.bf16.mxu1 %v6165_v11 }
 0x1c0   :  { %4438 = vmatpush1.bf16.msra.mxu0 %v6206_v12 }
 0x1c1   :  { %4439 = vmatprep.subr.bf16.mxu0 %v6213_v17 }
 0x1c2   :  { %2363 = vmatpush1.bf16.msra.mxu1 %v6163_v15 }
 0x1c3   :  { %2364 = vmatprep.subr.bf16.mxu1 %v6171_v16  ;;  %v6245_v16 = vld [vmem:[#allocation8 + $0x248] ss:$12 sps:$4 sm:$0xff]  }
 0x1c4   :  { %4440 = vmatpush1.bf16.msra.mxu0 %v6211_v19  ;;  %v6248_v19 = vld [vmem:[#allocation8 + $0x31c] ss:$12 sps:$4 sm:$0xff]  }
 0x1c5   :  { %4441 = vmatprep.subr.bf16.mxu0 %v6218_v22  ;;  %v6250_v22 = vld [vmem:[#allocation8 + $0x260] ss:$12 sps:$4 sm:$0xff]  }
 0x1c6   :  { %2365 = vmatpush1.bf16.msra.mxu1 %v6169_v18  ;;  %v6241_v18 = vld [vmem:[#allocation8 + $0x300] ss:$12 sps:$4 sm:$0xff]  }
 0x1c7   :  { %2366 = vmatprep.subr.bf16.mxu1 %v6177_v21  ;;  %v6249_v21 = vld [vmem:[#allocation8 + $0x188] ss:$12 sps:$4 sm:$0xff]  }
 0x1c8   :  { %4442 = vmatpush1.bf16.msra.mxu0 %v6216_v24  ;;  %v6253_v24 = vld [vmem:[#allocation8 + $0x334] ss:$12 sps:$4 sm:$0xff]  }
 0x1c9   :  { %4443 = vmatprep.subr.bf16.mxu0 %v6223_v25  ;;  %v6255_v25 = vld [vmem:[#allocation8 + $0x278] ss:$12 sps:$4 sm:$0xff]  }
 0x1ca   :  { %2367 = vmatpush1.bf16.msra.mxu1 %v6175_v23  ;;  %v6246_v23 = vld [vmem:[#allocation8 + $0x318] ss:$12 sps:$4 sm:$0xff]  }
 0x1cb   :  { %2368 = vmatprep.subr.bf16.mxu1 %v6183_v61  ;;  %v6254_v61 = vld [vmem:[#allocation8 + $0x1a0] ss:$12 sps:$4 sm:$0xff]  }
 0x1cc   :  { %4444 = vmatpush1.bf16.msra.mxu0 %v6221_v3  ;;  %v6251_v3 = vld [vmem:[#allocation8 + $0x330] ss:$12 sps:$4 sm:$0xff]  }
 0x1cd   :  { %4445 = vmatprep.subr.bf16.mxu0 %v6228_v28  ;;  %v6259_v28 = vld [vmem:[#allocation8 + $0x1b8] ss:$12 sps:$4 sm:$0xff]  }
 0x1ce   :  { %2369 = vmatpush1.bf16.msra.mxu1 %v6181_v26  ;;  %v6834_v26 = vld [vmem:[#allocation7 + $0x8] sm:$0xf] }
 0x1cf   :  { %2370 = vmatprep.subr.bf16.mxu1 %v6189_v27  ;;  %v6258_v27 = vld [vmem:[#allocation8 + $0x34c] ss:$12 sps:$4 sm:$0xff]  }
 0x1d0   :  { %4446 = vmatpush1.bf16.msra.mxu0 %v6226_v30  ;;  %v426_v30 = vrot.slane %v6834_v26, %v6796_v20 }
 0x1d1   :  { %4447 = vmatprep.subr.bf16.mxu0 %v6233_v32  ;;  %v6263_v32 = vld [vmem:[#allocation8 + $0x364] ss:$12 sps:$4 sm:$0xff]  }
 0x1d2   :  { %2371 = vmatpush1.bf16.msra.mxu1 %v6187_v29  ;;  %v422_v29 = vrot.slane %v6834_v26, %v6793_v53 }
 0x1d3   :  { %2372 = vmatprep.subr.bf16.mxu1 %v6195_v31  ;;  %v6256_v31 = vld [vmem:[#allocation8 + $0x348] ss:$12 sps:$4 sm:$0xff]  }
 0x1d4   :  { %4448 = vmatpush1.bf16.msra.mxu0 %v6231_v33 }
 0x1d5   :  { %4449 = vmatprep.subr.bf16.mxu0 %v6238_v36 }
 0x1d6   :  { %2373 = vmatpush1.bf16.msra.mxu1 %v6193_v35  ;;  %v6264_v35 = vld [vmem:[#allocation8 + $0x1d0] ss:$12 sps:$4 sm:$0xff]  }
 0x1d7   :  { %2374 = vmatprep.subr.bf16.mxu1 %v6201_v37 }
 0x1d8   :  { %4450 = vmatpush1.bf16.msra.mxu0 %v6236_v38  ;;  %v6265_v38 = vld [vmem:[#allocation8 + $0x2a8] ss:$12 sps:$4 sm:$0xff]  }
 0x1d9   :  { %4462 = vmatprep.subr.bf16.mxu0 %v6243_v40 }
 0x1da   :  { %2375 = vmatpush1.bf16.msra.mxu1 %v6199_v39 }
 0x1db   :  { %5481 = vmatprep.subr.bf16.mxu1 %v6205_v41  ;;  %v6261_v41 = vld [vmem:[#allocation8 + $0x360] ss:$12 sps:$4 sm:$0xff]  }
 0x1dd   :  { %2393 = vmatmul.mubr.bf16.vlgmr.msra.gmra.mrb[12].mxu1 %v6771_v34  ;;  %v401_v34 = vsub.s32 3, %v6788_v49 }
 0x1de   :  { %5482 = vmatpush3.bf16.msra.mxu1 %v6209_v42  ;;  %4666 = vmatprep.mubr.bf16.mxu1 %v6804_v14  ;;  %v6230_v14 = vld [vmem:[#allocation8 + $0x140] ss:$12 sps:$4 sm:$0xff]  }
 0x1df   :  { %5483 = vmatprep.subr.bf16.mxu1 %v6210_v43  ;;  %v402_v56 = vrot.slane %v6790_v52, %v401_v34  ;;  %v6244_v52 = vld [vmem:[#allocation8 + $0xb0] ss:$12 sps:$4 sm:$0xff]  }
 0x1e2   :  { %5484 = vmatpush3.bf16.msra.mxu1 %v6214_v44 }
 0x1e3   :  { %5485 = vmatprep.subr.bf16.mxu1 %v6215_v45  ;;  %v6268_v45 = vld [vmem:[#allocation8 + $0x37c] ss:$12 sps:$4 sm:$0xff]  }
 0x1e6   :  { %5486 = vmatpush3.bf16.msra.mxu1 %v6219_v46 }
 0x1e7   :  { %5487 = vmatprep.subr.bf16.mxu1 %v6220_v47 }
 0x1ea   :  { %5488 = vmatpush3.bf16.msra.mxu1 %v6224_v48  ;;  %v6269_v48 = vld [vmem:[#allocation8 + $0x1e8] ss:$12 sps:$4 sm:$0xff]  }
 0x1eb   :  { %5489 = vmatprep.subr.bf16.mxu1 %v6225_v50 }
 0x1ee   :  { %5490 = vmatpush3.bf16.msra.mxu1 %v6229_v54  ;;  %v6270_v54 = vld [vmem:[#allocation8 + $0x2c0] ss:$12 sps:$4 sm:$0xff]  }
 0x1ef   :  { %5491 = vmatprep.subr.bf16.mxu1 %v6230_v14 }
 0x1f0   :  { %v2050_v62 = vpop.f32.mrb[4].mxu1 }
 0x1f1   :  { %v5617_v63 = vadd.f32 %v2050_v62, %v398_v55  ;;  %v2052_v0 = vpop.f32.mrb[5].mxu1  ;;  %v6274_v62 = vld [vmem:[#allocation8 + $0x200] ss:$12 sps:$4 sm:$0xff]  }
 0x1f2   :  { %v5618_v1 = vadd.f32 %v2052_v0, %v402_v56  ;;  %v2054_v2 = vpop.f32.mrb[6].mxu1  ;;  %5492 = vmatpush3.bf16.msra.mxu1 %v6234_v58  ;;  %v6273_v58 = vld [vmem:[#allocation8 + $0x394] ss:$12 sps:$4 sm:$0xff]   ;;  %v6271_v0 = vld [vmem:[#allocation8 + $0x390] ss:$12 sps:$4 sm:$0xff]  }
 0x1f3   :  { %v5619_v5 = vadd.f32 %v2054_v2, %v398_v55  ;;  %v2056_v6 = vpop.f32.mrb[7].mxu1  ;;  %5493 = vmatprep.subr.bf16.mxu1 %v6235_v59  ;;  %v2405_v9 = vmax.f32 %v5617_v63, 0.0  ;;  %v6266_v55 = vld [vmem:[#allocation8 + $0x378] ss:$12 sps:$4 sm:$0xff]  }
 0x1f4   :  { %v5620_v8 = vadd.f32 %v2056_v6, %v402_v56  ;;  %v2406_v11 = vmax.f32 %v5618_v1, 0.0  ;;  %v6275_v63 = vld [vmem:[#allocation8 + $0x2d8] ss:$12 sps:$4 sm:$0xff]  }
 0x1f5   :  { %v2417_v10 = vmax.f32 %v5619_v5, 0.0  ;;  %v6278_v1 = vld [vmem:[#allocation8 + $0x3ac] ss:$12 sps:$4 sm:$0xff]   ;;  %v6276_v5 = vld [vmem:[#allocation8 + $0x3a8] ss:$12 sps:$4 sm:$0xff]  }
 0x1f6   :  { %v2418_v12 = vmax.f32 %v5620_v8, 0.0  ;;  %5494 = vmatpush3.bf16.msra.mxu1 %v6239_v4  ;;  %v6279_v2 = vld [vmem:[#allocation8 + $0x218] ss:$12 sps:$4 sm:$0xff]   ;;  %v6280_v4 = vld [vmem:[#allocation8 + $0x2f0] ss:$12 sps:$4 sm:$0xff]  }
 0x1f7   :  { %v6829_v15 = vpack.c.bf16 %v2417_v10, %v2405_v9  ;;  %5495 = vmatprep.subr.bf16.mxu1 %v6240_v7  ;;  %v2308_v33 = vpop.f32.mrb[4].mxu0  ;;  %v6283_v6 = vld [vmem:[#allocation8 + $0x3c4] ss:$12 sps:$4 sm:$0xff]   ;;  %v6285_v8 = vld [vmem:[#allocation8 + $0x3c8] ss:$12 sps:$4 sm:$0xff]  }
 0x1f8   :  { %v2430_v17 = vpack.c.bf16 %v2418_v12, %v2406_v11  ;;  %v5629_v36 = vadd.f32 %v2308_v33, %v422_v29  ;;  %v2310_v37 = vpop.f32.mrb[5].mxu0  ;;  %v6284_v7 = vld [vmem:[#allocation8 + $0x230] ss:$12 sps:$4 sm:$0xff]   ;;  %v6281_v9 = vld [vmem:[#allocation8 + $0x3c0] ss:$12 sps:$4 sm:$0xff]  }
 0x1f9   :  { %v5630_v39 = vadd.f32 %v2310_v37, %v426_v30  ;;  %v2312_v40 = vpop.f32.mrb[6].mxu0  ;;  %v6288_v10 = vld [vmem:[#allocation8 + $0x3dc] ss:$12 sps:$4 sm:$0xff]   ;;  %v6290_v12 = vld [vmem:[#allocation8 + $0x3e0] ss:$12 sps:$4 sm:$0xff]  }
 0x1fa   :  { %4451 = vmatprep.mubr.bf16.mxu0 %v2430_v17  ;;  %5496 = vmatpush3.bf16.msra.mxu1 %v6244_v52  ;;  %v2411_v42 = vmax.f32 %v5629_v36, 0.0  ;;  %v5631_v43 = vadd.f32 %v2312_v40, %v422_v29  ;;  %v2314_v44 = vpop.f32.mrb[7].mxu0  ;;  %v6289_v11 = vld [vmem:[#allocation8 + $0x308] ss:$12 sps:$4 sm:$0xff]   ;;  %v6286_v52 = vld [vmem:[#allocation8 + $0x3d8] ss:$12 sps:$4 sm:$0xff]  }
 0x1fb   :  { %4452 = vmatmul.mubr.bf16.vlgmr.msra.gmra.mrb[8].mxu0 %v6829_v15  ;;  %5503 = vmatprep.subr.bf16.mxu1 %v6245_v16  ;;  %v2412_v46 = vmax.f32 %v5630_v39, 0.0  ;;  %v5632_v47 = vadd.f32 %v2314_v44, %v426_v30  ;;  %v6293_v16 = vld [vmem:[#allocation8 + $0x3f4] ss:$12 sps:$4 sm:$0xff]   ;;  %v6306_v29 = vld [vmem:[#allocation8 + $0x438] ss:$12 sps:$4 sm:$0xff]  }
 0x1fc   :  { %4463 = vmatpush1.bf16.msra.mxu0 %v6241_v18  ;;  %4494 = vmatprep.mubr.bf16.mxu0 %v6814_v60  ;;  %v2423_v50 = vmax.f32 %v5631_v43, 0.0  ;;  %v6295_v18 = vld [vmem:[#allocation8 + $0x3f8] ss:$12 sps:$4 sm:$0xff]   ;;  %v6314_v30 = vld [vmem:[#allocation8 + $0x380] ss:$12 sps:$4 sm:$0xff]  }
 0x1fd   :  { %4667 = vmatmul.mubr.bf16.vlgmr.msra.gmra.mrb[16].mxu1 %v6802_v13  ;;  %4464 = vmatprep.subr.bf16.mxu0 %v6248_v19  ;;  %v6260_v13 = vld [vmem:[#allocation8 + $0x290] ss:$12 sps:$4 sm:$0xff]   ;;  %v2424_v14 = vmax.f32 %v5632_v47, 0.0  ;;  %v6318_v33 = vld [vmem:[#allocation8 + $0x46c] ss:$12 sps:$4 sm:$0xff]  }
 0x1fe   :  { %5504 = vmatpush3.bf16.msra.mxu1 %v6249_v21  ;;  %4707 = vmatprep.mubr.bf16.mxu1 %v2430_v17  ;;  %v6840_v56 = vpack.c.bf16 %v2423_v50, %v2411_v42  ;;  %v6294_v17 = vld [vmem:[#allocation8 + $0x320] ss:$12 sps:$4 sm:$0xff]   ;;  %v6291_v19 = vld [vmem:[#allocation8 + $0x3f0] ss:$12 sps:$4 sm:$0xff]   ;;  %v6316_v37 = vld [vmem:[#allocation8 + $0x468] ss:$12 sps:$4 sm:$0xff]  }
 0x1ff   :  { %5505 = vmatprep.subr.bf16.mxu1 %v6250_v22  ;;  %v6842_v59 = vpack.c.bf16 %v2424_v14, %v2412_v46  ;;  %v6298_v21 = vld [vmem:[#allocation8 + $0x40c] ss:$12 sps:$4 sm:$0xff]   ;;  %v6320_v36 = vld [vmem:[#allocation8 + $0x470] ss:$12 sps:$4 sm:$0xff]   ;;  %v6325_v40 = vld [vmem:[#allocation8 + $0x548] ss:$12 sps:$4 sm:$0xff]  }
 0x200   :  { %4465 = vmatpush1.bf16.msra.mxu0 %v6246_v23  ;;  %v6299_v22 = vld [vmem:[#allocation8 + $0x338] ss:$12 sps:$4 sm:$0xff]   ;;  %v6300_v23 = vld [vmem:[#allocation8 + $0x410] ss:$12 sps:$4 sm:$0xff]   ;;  %v6329_v43 = vld [vmem:[#allocation8 + $0x488] ss:$12 sps:$4 sm:$0xff]  }
 0x201   :  { %4466 = vmatprep.subr.bf16.mxu0 %v6253_v24  ;;  %v6296_v24 = vld [vmem:[#allocation8 + $0x408] ss:$12 sps:$4 sm:$0xff]   ;;  %v6324_v39 = vld [vmem:[#allocation8 + $0x3b0] ss:$12 sps:$4 sm:$0xff]   ;;  %v6330_v44 = vld [vmem:[#allocation8 + $0x560] ss:$12 sps:$4 sm:$0xff]  }
 0x202   :  { %5506 = vmatpush3.bf16.msra.mxu1 %v6254_v61  ;;  %v6304_v61 = vld [vmem:[#allocation8 + $0x350] ss:$12 sps:$4 sm:$0xff]   ;;  %v6333_v46 = vld [vmem:[#allocation8 + $0x4b4] ss:$12 sps:$4 sm:$0xff]   ;;  %v6339_v14 = vld [vmem:[#allocation8 + $0x4b8] ss:$12 sps:$4 sm:$0xff]  }
 0x203   :  { %5507 = vmatprep.subr.bf16.mxu1 %v6255_v25  ;;  %v6305_v25 = vld [vmem:[#allocation8 + $0x428] ss:$12 sps:$4 sm:$0xff]   ;;  %v6334_v47 = vld [vmem:[#allocation8 + $0x4a0] ss:$12 sps:$4 sm:$0xff]   ;;  %v6331_v50 = vld [vmem:[#allocation8 + $0x4b0] ss:$12 sps:$4 sm:$0xff]  }
 0x204   :  { %4467 = vmatpush1.bf16.msra.mxu0 %v6251_v3  ;;  %v6308_v3 = vld [vmem:[#allocation8 + $0x43c] ss:$12 sps:$4 sm:$0xff]  }
 0x205   :  { %4468 = vmatprep.subr.bf16.mxu0 %v6258_v27  ;;  %v6309_v27 = vld [vmem:[#allocation8 + $0x368] ss:$12 sps:$4 sm:$0xff]  }
 0x206   :  { %5508 = vmatpush3.bf16.msra.mxu1 %v6259_v28  ;;  %v6310_v28 = vld [vmem:[#allocation8 + $0x440] ss:$12 sps:$4 sm:$0xff]   ;;  %v6328_v42 = vld [vmem:[#allocation8 + $0x49c] ss:$12 sps:$4 sm:$0xff]  }
 0x207   :  { %5509 = vmatprep.subr.bf16.mxu1 %v6260_v13  ;;  %v6313_v13 = vld [vmem:[#allocation8 + $0x454] ss:$12 sps:$4 sm:$0xff]  }
 0x208   :  { %4469 = vmatpush1.bf16.msra.mxu0 %v6256_v31  ;;  %v6315_v31 = vld [vmem:[#allocation8 + $0x458] ss:$12 sps:$4 sm:$0xff]  }
 0x209   :  { %4470 = vmatprep.subr.bf16.mxu0 %v6263_v32  ;;  %v6311_v32 = vld [vmem:[#allocation8 + $0x450] ss:$12 sps:$4 sm:$0xff]  }
 0x20a   :  { %5510 = vmatpush3.bf16.msra.mxu1 %v6264_v35  ;;  %v6319_v35 = vld [vmem:[#allocation8 + $0x398] ss:$12 sps:$4 sm:$0xff]  }
 0x20b   :  { %5511 = vmatprep.subr.bf16.mxu1 %v6265_v38  ;;  %v6323_v38 = vld [vmem:[#allocation8 + $0x484] ss:$12 sps:$4 sm:$0xff]  }
 0x20c   :  { %4471 = vmatpush1.bf16.msra.mxu0 %v6261_v41  ;;  %v6321_v41 = vld [vmem:[#allocation8 + $0x480] ss:$12 sps:$4 sm:$0xff]  }
 0x20d   :  { %4472 = vmatprep.subr.bf16.mxu0 %v6268_v45  ;;  %v6326_v45 = vld [vmem:[#allocation8 + $0x498] ss:$12 sps:$4 sm:$0xff]  }
 0x20e   :  { %5512 = vmatpush3.bf16.msra.mxu1 %v6269_v48  ;;  %v6335_v48 = vld [vmem:[#allocation8 + $0x578] ss:$12 sps:$4 sm:$0xff]  }
 0x20f   :  { %5513 = vmatprep.subr.bf16.mxu1 %v6270_v54  ;;  %v6338_v54 = vld [vmem:[#allocation8 + $0x4cc] ss:$12 sps:$4 sm:$0xff]  }
 0x210   :  { %4473 = vmatpush1.bf16.msra.mxu0 %v6266_v55  ;;  %v6340_v55 = vld [vmem:[#allocation8 + $0x590] ss:$12 sps:$4 sm:$0xff]  }
 0x211   :  { %4474 = vmatprep.subr.bf16.mxu0 %v6273_v58  ;;  %v6336_v58 = vld [vmem:[#allocation8 + $0x4c8] ss:$12 sps:$4 sm:$0xff]  }
 0x212   :  { %5514 = vmatpush3.bf16.msra.mxu1 %v6274_v62  ;;  %v6343_v62 = vld [vmem:[#allocation8 + $0x4e4] ss:$12 sps:$4 sm:$0xff]  }
 0x213   :  { %5515 = vmatprep.subr.bf16.mxu1 %v6275_v63  ;;  %v6345_v63 = vld [vmem:[#allocation8 + $0x5a8] ss:$12 sps:$4 sm:$0xff]  }
 0x214   :  { %4475 = vmatpush1.bf16.msra.mxu0 %v6271_v0  ;;  %v6341_v0 = vld [vmem:[#allocation8 + $0x4e0] ss:$12 sps:$4 sm:$0xff]  }
 0x215   :  { %4476 = vmatprep.subr.bf16.mxu0 %v6278_v1  ;;  %v6348_v1 = vld [vmem:[#allocation8 + $0x4fc] ss:$12 sps:$4 sm:$0xff]  }
 0x216   :  { %5516 = vmatpush3.bf16.msra.mxu1 %v6279_v2  ;;  %v413_v2 = vsub.s32 6, %v6788_v49 }
 0x217   :  { %5517 = vmatprep.subr.bf16.mxu1 %v6280_v4  ;;  %v6349_v4 = vld [vmem:[#allocation8 + $0x4e8] ss:$12 sps:$4 sm:$0xff]  }
 0x218   :  { %4477 = vmatpush1.bf16.msra.mxu0 %v6276_v5  ;;  %v417_v5 = vsub.s32 7, %v6788_v49  ;;  %v6468_v49 = vld [vmem:[#allocation8 + $0x784] ss:$12 sps:$4 sm:$0xff]  }
 0x219   :  { %4478 = vmatprep.subr.bf16.mxu0 %v6283_v6  ;;  %v6350_v6 = vld [vmem:[#allocation8 + $0x5c0] ss:$12 sps:$4 sm:$0xff]  }
 0x21a   :  { %5518 = vmatpush3.bf16.msra.mxu1 %v6284_v7  ;;  %v6346_v7 = vld [vmem:[#allocation8 + $0x4f8] ss:$12 sps:$4 sm:$0xff]  }
 0x21b   :  { %5525 = vmatprep.subr.bf16.mxu1 %v6285_v8  ;;  %v6514_v8 = vld [vmem:[#allocation7] sm:$0xff] }
 0x21c   :  { %4479 = vmatpush1.bf16.msra.mxu0 %v6281_v9  ;;  %v414_v9 = vrot.slane %v6514_v8, %v413_v2  ;;  %v6395_v2 = vld [vmem:[#allocation8 + $0x758] ss:$12 sps:$4 sm:$0xff]  }
 0x21d   :  { %4708 = vmatmul.mubr.bf16.vlgmr.msra.gmra.mrb[20].mxu1 %v6829_v15  ;;  %4480 = vmatprep.subr.bf16.mxu0 %v6288_v10  ;;  %v6303_v15 = vld [vmem:[#allocation8 + $0x424] ss:$12 sps:$4 sm:$0xff]   ;;  %v6353_v10 = vld [vmem:[#allocation8 + $0x514] ss:$12 sps:$4 sm:$0xff]  }
 0x21e   :  { %5526 = vmatpush3.bf16.msra.mxu1 %v6289_v11  ;;  %4748 = vmatprep.mubr.bf16.mxu1 %v6814_v60  ;;  %v6301_v60 = vld [vmem:[#allocation8 + $0x420] ss:$12 sps:$4 sm:$0xff]   ;;  %v418_v11 = vrot.slane %v6514_v8, %v417_v5  ;;  %v6396_v8 = vld [vmem:[#allocation8 + $0x5e8] ss:$12 sps:$4 sm:$0xff]  }
 0x21f   :  { %5527 = vmatprep.subr.bf16.mxu1 %v6290_v12  ;;  %v6354_v12 = vld [vmem:[#allocation8 + $0x500] ss:$12 sps:$4 sm:$0xff]  }
 0x220   :  { %4481 = vmatpush1.bf16.msra.mxu0 %v6286_v52  ;;  %v6355_v52 = vld [vmem:[#allocation8 + $0x5d8] ss:$12 sps:$4 sm:$0xff]  }
 0x221   :  { %4482 = vmatprep.subr.bf16.mxu0 %v6293_v16  ;;  %v6398_v5 = vld [vmem:[#allocation8 + $0x5ec] ss:$12 sps:$4 sm:$0xff]  }
 0x222   :  { %5528 = vmatpush3.bf16.msra.mxu1 %v6294_v17  ;;  %v6351_v17 = vld [vmem:[#allocation8 + $0x510] ss:$12 sps:$4 sm:$0xff]  }
 0x223   :  { %5529 = vmatprep.subr.bf16.mxu1 %v6295_v18 }
 0x224   :  { %4483 = vmatpush1.bf16.msra.mxu0 %v6291_v19 }
 0x225   :  { %4484 = vmatprep.subr.bf16.mxu0 %v6298_v21  ;;  %v6358_v21 = vld [vmem:[#allocation8 + $0x52c] ss:$12 sps:$4 sm:$0xff]  }
 0x226   :  { %5530 = vmatpush3.bf16.msra.mxu1 %v6299_v22 }
 0x227   :  { %5531 = vmatprep.subr.bf16.mxu1 %v6300_v23 }
 0x228   :  { %4485 = vmatpush1.bf16.msra.mxu0 %v6296_v24  ;;  %v6359_v24 = vld [vmem:[#allocation8 + $0x518] ss:$12 sps:$4 sm:$0xff]  }
 0x229   :  { %4486 = vmatprep.subr.bf16.mxu0 %v6303_v15 }
 0x22a   :  { %5532 = vmatpush3.bf16.msra.mxu1 %v6304_v61 }
 0x22b   :  { %5533 = vmatprep.subr.bf16.mxu1 %v6305_v25 }
 0x22c   :  { %4487 = vmatpush1.bf16.msra.mxu0 %v6301_v60  ;;  %v6360_v60 = vld [vmem:[#allocation8 + $0x5f0] ss:$12 sps:$4 sm:$0xff]  }
 0x22d   :  { %4488 = vmatprep.subr.bf16.mxu0 %v6308_v3 }
 0x22e   :  { %5534 = vmatpush3.bf16.msra.mxu1 %v6309_v27  ;;  %v6356_v27 = vld [vmem:[#allocation8 + $0x528] ss:$12 sps:$4 sm:$0xff]  }
 0x22f   :  { %5535 = vmatprep.subr.bf16.mxu1 %v6310_v28 }
 0x230   :  { %4489 = vmatpush1.bf16.msra.mxu0 %v6306_v29  ;;  %v6363_v29 = vld [vmem:[#allocation8 + $0x544] ss:$12 sps:$4 sm:$0xff]  }
 0x231   :  { %4490 = vmatprep.subr.bf16.mxu0 %v6313_v13 }
 0x232   :  { %5536 = vmatpush3.bf16.msra.mxu1 %v6314_v30 }
 0x233   :  { %5537 = vmatprep.subr.bf16.mxu1 %v6315_v31  ;;  %v6364_v31 = vld [vmem:[#allocation8 + $0x530] ss:$12 sps:$4 sm:$0xff]  }
 0x234   :  { %4491 = vmatpush1.bf16.msra.mxu0 %v6311_v32 }
 0x235   :  { %4492 = vmatprep.subr.bf16.mxu0 %v6318_v33  ;;  %v6365_v33 = vld [vmem:[#allocation8 + $0x6c8] ss:$12 sps:$4 sm:$0xff]  }
 0x236   :  { %5538 = vmatpush3.bf16.msra.mxu1 %v6319_v35 }
 0x237   :  { %5539 = vmatprep.subr.bf16.mxu1 %v6320_v36  ;;  %v6361_v36 = vld [vmem:[#allocation8 + $0x540] ss:$12 sps:$4 sm:$0xff]  }
 0x238   :  { %4493 = vmatpush1.bf16.msra.mxu0 %v6316_v37  ;;  %v6368_v37 = vld [vmem:[#allocation8 + $0x55c] ss:$12 sps:$4 sm:$0xff]  }
 0x239   :  { %4505 = vmatprep.subr.bf16.mxu0 %v6323_v38  ;;  %v6369_v38 = vld [vmem:[#allocation8 + $0x608] ss:$12 sps:$4 sm:$0xff]  }
 0x23a   :  { %5540 = vmatpush3.bf16.msra.mxu1 %v6324_v39  ;;  %v6370_v39 = vld [vmem:[#allocation8 + $0x6e0] ss:$12 sps:$4 sm:$0xff]  }
 0x23b   :  { %4495 = vmatmul.mubr.bf16.vlgmr.msra.gmra.mrb[8].mxu0 %v6812_v57  ;;  %5547 = vmatprep.subr.bf16.mxu1 %v6325_v40  ;;  %v6366_v40 = vld [vmem:[#allocation8 + $0x558] ss:$12 sps:$4 sm:$0xff]  }
 0x23c   :  { %4506 = vmatpush1.bf16.msra.mxu0 %v6321_v41  ;;  %v6373_v41 = vld [vmem:[#allocation8 + $0x574] ss:$12 sps:$4 sm:$0xff]  }
 0x23d   :  { %4749 = vmatmul.mubr.bf16.vlgmr.msra.gmra.mrb[24].mxu1 %v6812_v57  ;;  %4507 = vmatprep.subr.bf16.mxu0 %v6328_v42  ;;  %v6344_v57 = vld [vmem:[#allocation8 + $0x4d0] ss:$12 sps:$4 sm:$0xff]   ;;  %v6374_v42 = vld [vmem:[#allocation8 + $0x620] ss:$12 sps:$4 sm:$0xff]  }
 0x23e   :  { %5548 = vmatpush3.bf16.msra.mxu1 %v6329_v43  ;;  %v6375_v43 = vld [vmem:[#allocation8 + $0x6f8] ss:$12 sps:$4 sm:$0xff]  }
 0x23f   :  { %5549 = vmatprep.subr.bf16.mxu1 %v6330_v44  ;;  %v6371_v44 = vld [vmem:[#allocation8 + $0x570] ss:$12 sps:$4 sm:$0xff]  }
 0x240   :  { %4508 = vmatpush1.bf16.msra.mxu0 %v6326_v45  ;;  %v6378_v45 = vld [vmem:[#allocation8 + $0x58c] ss:$12 sps:$4 sm:$0xff]  }
 0x241   :  { %4509 = vmatprep.subr.bf16.mxu0 %v6333_v46  ;;  %v6379_v46 = vld [vmem:[#allocation8 + $0x638] ss:$12 sps:$4 sm:$0xff]  }
 0x242   :  { %5550 = vmatpush3.bf16.msra.mxu1 %v6334_v47  ;;  %v6380_v47 = vld [vmem:[#allocation8 + $0x710] ss:$12 sps:$4 sm:$0xff]  }
 0x243   :  { %5551 = vmatprep.subr.bf16.mxu1 %v6335_v48  ;;  %v6376_v48 = vld [vmem:[#allocation8 + $0x588] ss:$12 sps:$4 sm:$0xff]  }
 0x244   :  { %4510 = vmatpush1.bf16.msra.mxu0 %v6331_v50  ;;  %v6383_v50 = vld [vmem:[#allocation8 + $0x5a4] ss:$12 sps:$4 sm:$0xff]  }
 0x245   :  { %4511 = vmatprep.subr.bf16.mxu0 %v6338_v54  ;;  %v6384_v54 = vld [vmem:[#allocation8 + $0x650] ss:$12 sps:$4 sm:$0xff]  }
 0x246   :  { %5552 = vmatpush3.bf16.msra.mxu1 %v6339_v14  ;;  %v6385_v14 = vld [vmem:[#allocation8 + $0x728] ss:$12 sps:$4 sm:$0xff]  }
 0x247   :  { %5553 = vmatprep.subr.bf16.mxu1 %v6340_v55  ;;  %v6381_v55 = vld [vmem:[#allocation8 + $0x5a0] ss:$12 sps:$4 sm:$0xff]  }
 0x248   :  { %4512 = vmatpush1.bf16.msra.mxu0 %v6336_v58  ;;  %v6388_v58 = vld [vmem:[#allocation8 + $0x5bc] ss:$12 sps:$4 sm:$0xff]  }
 0x249   :  { %4513 = vmatprep.subr.bf16.mxu0 %v6343_v62  ;;  %v6389_v62 = vld [vmem:[#allocation8 + $0x668] ss:$12 sps:$4 sm:$0xff]  }
 0x24a   :  { %5554 = vmatpush3.bf16.msra.mxu1 %v6344_v57  ;;  %v6390_v57 = vld [vmem:[#allocation8 + $0x740] ss:$12 sps:$4 sm:$0xff]  }
 0x24b   :  { %5555 = vmatprep.subr.bf16.mxu1 %v6345_v63  ;;  %v6386_v63 = vld [vmem:[#allocation8 + $0x5b8] ss:$12 sps:$4 sm:$0xff]  }
 0x24c   :  { %4514 = vmatpush1.bf16.msra.mxu0 %v6341_v0  ;;  %v6393_v0 = vld [vmem:[#allocation8 + $0x5d4] ss:$12 sps:$4 sm:$0xff]  }
 0x24d   :  { %4515 = vmatprep.subr.bf16.mxu0 %v6348_v1  ;;  %v6394_v1 = vld [vmem:[#allocation8 + $0x680] ss:$12 sps:$4 sm:$0xff]  }
 0x24e   :  { %5556 = vmatpush3.bf16.msra.mxu1 %v6349_v4  ;;  %v6391_v4 = vld [vmem:[#allocation8 + $0x5d0] ss:$12 sps:$4 sm:$0xff]  }
 0x24f   :  { %5557 = vmatprep.subr.bf16.mxu1 %v6350_v6  ;;  %v6399_v6 = vld [vmem:[#allocation8 + $0x698] ss:$12 sps:$4 sm:$0xff]  }
 0x250   :  { %4516 = vmatpush1.bf16.msra.mxu0 %v6346_v7  ;;  %v2222_v16 = vpop.f32.mrb[8].mxu1  ;;  %v6400_v7 = vld [vmem:[#allocation8 + $0x770] ss:$12 sps:$4 sm:$0xff]  }
 0x251   :  { %v5625_v18 = vadd.f32 %v2222_v16, %v414_v9  ;;  %v2224_v19 = vpop.f32.mrb[9].mxu1  ;;  %4517 = vmatprep.subr.bf16.mxu0 %v6353_v10  ;;  %v6404_v10 = vld [vmem:[#allocation8 + $0x6b0] ss:$12 sps:$4 sm:$0xff]   ;;  %v6430_v16 = vld [vmem:[#allocation8 + $0x788] ss:$12 sps:$4 sm:$0xff]  }
 0x252   :  { %v5626_v22 = vadd.f32 %v2224_v19, %v418_v11  ;;  %v2226_v23 = vpop.f32.mrb[10].mxu1  ;;  %5558 = vmatpush3.bf16.msra.mxu1 %v6354_v12  ;;  %v6401_v12 = vld [vmem:[#allocation8 + $0x600] ss:$12 sps:$4 sm:$0xff]  }
 0x253   :  { %v2409_v15 = vmax.f32 %v5625_v18, 0.0  ;;  %v5627_v61 = vadd.f32 %v2226_v23, %v414_v9  ;;  %v2228_v25 = vpop.f32.mrb[11].mxu1  ;;  %5559 = vmatprep.subr.bf16.mxu1 %v6355_v52  ;;  %v6403_v9 = vld [vmem:[#allocation8 + $0x604] ss:$12 sps:$4 sm:$0xff]   ;;  %v6407_v52 = vld [vmem:[#allocation8 + $0x61c] ss:$12 sps:$4 sm:$0xff]  }
 0x254   :  { %v5628_v3 = vadd.f32 %v2228_v25, %v418_v11  ;;  %4518 = vmatpush1.bf16.msra.mxu0 %v6351_v17  ;;  %v2410_v13 = vmax.f32 %v5626_v22, 0.0  ;;  %v6429_v11 = vld [vmem:[#allocation8 + $0x848] ss:$12 sps:$4 sm:$0xff]   ;;  %v6434_v17 = vld [vmem:[#allocation8 + $0x860] ss:$12 sps:$4 sm:$0xff]  }
 0x255   :  { %v2421_v28 = vmax.f32 %v5627_v61, 0.0  ;;  %4519 = vmatprep.subr.bf16.mxu0 %v6358_v21  ;;  %v6405_v18 = vld [vmem:[#allocation8 + $0x618] ss:$12 sps:$4 sm:$0xff]   ;;  %v6410_v19 = vld [vmem:[#allocation8 + $0x634] ss:$12 sps:$4 sm:$0xff]  }
 0x256   :  { %v2422_v30 = vmax.f32 %v5628_v3, 0.0  ;;  %5560 = vmatpush3.bf16.msra.mxu1 %v6359_v24  ;;  %v6435_v21 = vld [vmem:[#allocation8 + $0x7a0] ss:$12 sps:$4 sm:$0xff]   ;;  %v6439_v22 = vld [vmem:[#allocation8 + $0x878] ss:$12 sps:$4 sm:$0xff]  }
 0x257   :  { %v6850_v32 = vpack.c.bf16 %v2421_v28, %v2409_v15  ;;  %5561 = vmatprep.subr.bf16.mxu1 %v6360_v60  ;;  %v6408_v23 = vld [vmem:[#allocation8 + $0x630] ss:$12 sps:$4 sm:$0xff]   ;;  %v6413_v24 = vld [vmem:[#allocation8 + $0x64c] ss:$12 sps:$4 sm:$0xff]   ;;  %v6411_v25 = vld [vmem:[#allocation8 + $0x648] ss:$12 sps:$4 sm:$0xff]  }
 0x258   :  { %v2434_v35 = vpack.c.bf16 %v2422_v30, %v2410_v13  ;;  %4520 = vmatpush1.bf16.msra.mxu0 %v6356_v27  ;;  %v6440_v15 = vld [vmem:[#allocation8 + $0x7b8] ss:$12 sps:$4 sm:$0xff]   ;;  %v6444_v61 = vld [vmem:[#allocation8 + $0x890] ss:$12 sps:$4 sm:$0xff]   ;;  %v6449_v3 = vld [vmem:[#allocation8 + $0x8a8] ss:$12 sps:$4 sm:$0xff]  }
 0x259   :  { %4521 = vmatprep.subr.bf16.mxu0 %v6363_v29  ;;  %v6445_v60 = vld [vmem:[#allocation8 + $0x7d0] ss:$12 sps:$4 sm:$0xff]   ;;  %v6414_v27 = vld [vmem:[#allocation8 + $0x660] ss:$12 sps:$4 sm:$0xff]   ;;  %v6450_v29 = vld [vmem:[#allocation8 + $0x7e8] ss:$12 sps:$4 sm:$0xff]  }
 0x25a   :  { %4537 = vmatprep.mubr.bf16.mxu0 %v2434_v35  ;;  %5562 = vmatpush3.bf16.msra.mxu1 %v6364_v31  ;;  %v6419_v28 = vld [vmem:[#allocation8 + $0x67c] ss:$12 sps:$4 sm:$0xff]   ;;  %v6454_v13 = vld [vmem:[#allocation8 + $0x8c0] ss:$12 sps:$4 sm:$0xff]   ;;  %v6417_v30 = vld [vmem:[#allocation8 + $0x678] ss:$12 sps:$4 sm:$0xff]  }
 0x25b   :  { %4789 = vmatprep.mubr.bf16.mxu1 %v2434_v35  ;;  %5569 = vmatprep.subr.bf16.mxu1 %v6365_v33  ;;  %v6422_v31 = vld [vmem:[#allocation8 + $0x694] ss:$12 sps:$4 sm:$0xff]   ;;  %v6459_v33 = vld [vmem:[#allocation8 + $0x8d8] ss:$12 sps:$4 sm:$0xff]   ;;  %v6420_v35 = vld [vmem:[#allocation8 + $0x690] ss:$12 sps:$4 sm:$0xff]  }
 0x25c   :  { %4522 = vmatpush1.bf16.msra.mxu0 %v6361_v36  ;;  %v6425_v36 = vld [vmem:[#allocation8 + $0x6ac] ss:$12 sps:$4 sm:$0xff]  }
 0x25d   :  { %4790 = vmatmul.mubr.bf16.vlgmr.msra.gmra.mrb[28].mxu1 %v6850_v32  ;;  %4523 = vmatprep.subr.bf16.mxu0 %v6368_v37  ;;  %v6460_v37 = vld [vmem:[#allocation8 + $0x818] ss:$12 sps:$4 sm:$0xff]  }
 0x25e   :  { %5570 = vmatpush3.bf16.msra.mxu1 %v6369_v38  ;;  %4830 = vmatprep.mubr.bf16.mxu1 %v6842_v59  ;;  %v6464_v38 = vld [vmem:[#allocation8 + $0x8f0] ss:$12 sps:$4 sm:$0xff]  }
 0x25f   :  { %5571 = vmatprep.subr.bf16.mxu1 %v6370_v39  ;;  %v6423_v39 = vld [vmem:[#allocation8 + $0x6a8] ss:$12 sps:$4 sm:$0xff]  }
 0x260   :  { %4524 = vmatpush1.bf16.msra.mxu0 %v6366_v40  ;;  %v6428_v40 = vld [vmem:[#allocation8 + $0x6c4] ss:$12 sps:$4 sm:$0xff]  }
 0x261   :  { %4525 = vmatprep.subr.bf16.mxu0 %v6373_v41  ;;  %v6465_v41 = vld [vmem:[#allocation8 + $0x830] ss:$12 sps:$4 sm:$0xff]  }
 0x262   :  { %5572 = vmatpush3.bf16.msra.mxu1 %v6374_v42  ;;  %v6426_v42 = vld [vmem:[#allocation8 + $0x6c0] ss:$12 sps:$4 sm:$0xff]  }
 0x263   :  { %5573 = vmatprep.subr.bf16.mxu1 %v6375_v43  ;;  %v6433_v43 = vld [vmem:[#allocation8 + $0x6dc] ss:$12 sps:$4 sm:$0xff]  }
 0x264   :  { %4526 = vmatpush1.bf16.msra.mxu0 %v6371_v44  ;;  %v6431_v44 = vld [vmem:[#allocation8 + $0x6d8] ss:$12 sps:$4 sm:$0xff]  }
 0x265   :  { %4527 = vmatprep.subr.bf16.mxu0 %v6378_v45  ;;  %v6438_v45 = vld [vmem:[#allocation8 + $0x6f4] ss:$12 sps:$4 sm:$0xff]  }
 0x266   :  { %5574 = vmatpush3.bf16.msra.mxu1 %v6379_v46  ;;  %v6436_v46 = vld [vmem:[#allocation8 + $0x6f0] ss:$12 sps:$4 sm:$0xff]  }
 0x267   :  { %5575 = vmatprep.subr.bf16.mxu1 %v6380_v47  ;;  %v6443_v47 = vld [vmem:[#allocation8 + $0x70c] ss:$12 sps:$4 sm:$0xff]  }
 0x268   :  { %4528 = vmatpush1.bf16.msra.mxu0 %v6376_v48  ;;  %v6441_v48 = vld [vmem:[#allocation8 + $0x708] ss:$12 sps:$4 sm:$0xff]  }
 0x269   :  { %4529 = vmatprep.subr.bf16.mxu0 %v6383_v50  ;;  %v6448_v50 = vld [vmem:[#allocation8 + $0x724] ss:$12 sps:$4 sm:$0xff]  }
 0x26a   :  { %5576 = vmatpush3.bf16.msra.mxu1 %v6384_v54  ;;  %v6446_v54 = vld [vmem:[#allocation8 + $0x720] ss:$12 sps:$4 sm:$0xff]  }
 0x26b   :  { %5577 = vmatprep.subr.bf16.mxu1 %v6385_v14  ;;  %v6453_v14 = vld [vmem:[#allocation8 + $0x73c] ss:$12 sps:$4 sm:$0xff]  }
 0x26c   :  { %4530 = vmatpush1.bf16.msra.mxu0 %v6381_v55  ;;  %v6451_v55 = vld [vmem:[#allocation8 + $0x738] ss:$12 sps:$4 sm:$0xff]  }
 0x26d   :  { %4531 = vmatprep.subr.bf16.mxu0 %v6388_v58  ;;  %v430_v58 = vrot.slane %v6834_v26, %v6821_v51 }
 0x26e   :  { %5578 = vmatpush3.bf16.msra.mxu1 %v6389_v62  ;;  %v6458_v62 = vld [vmem:[#allocation8 + $0x754] ss:$12 sps:$4 sm:$0xff]  }
 0x26f   :  { %5579 = vmatprep.subr.bf16.mxu1 %v6390_v57  ;;  %v434_v57 = vrot.slane %v6834_v26, %v401_v34 }
 0x270   :  { %4532 = vmatpush1.bf16.msra.mxu0 %v6386_v63 }
 0x271   :  { %4533 = vmatprep.subr.bf16.mxu0 %v6393_v0  ;;  %v6456_v0 = vld [vmem:[#allocation8 + $0x750] ss:$12 sps:$4 sm:$0xff]  }
 0x272   :  { %5580 = vmatpush3.bf16.msra.mxu1 %v6394_v1 }
 0x273   :  { %5581 = vmatprep.subr.bf16.mxu1 %v6395_v2 }
 0x274   :  { %4534 = vmatpush1.bf16.msra.mxu0 %v6391_v4  ;;  %v6463_v4 = vld [vmem:[#allocation8 + $0x76c] ss:$12 sps:$4 sm:$0xff]  }
 0x275   :  { %4535 = vmatprep.subr.bf16.mxu0 %v6398_v5 }
 0x276   :  { %5582 = vmatpush3.bf16.msra.mxu1 %v6399_v6 }
 0x277   :  { %5583 = vmatprep.subr.bf16.mxu1 %v6400_v7 }
 0x278   :  { %4536 = vmatpush1.bf16.msra.mxu0 %v6396_v8 }
 0x279   :  { %4548 = vmatprep.subr.bf16.mxu0 %v6403_v9 }
 0x27a   :  { %5584 = vmatpush3.bf16.msra.mxu1 %v6404_v10 }
 0x27b   :  { %4538 = vmatmul.mubr.bf16.vlgmr.msra.gmra.mrb[8].mxu0 %v6850_v32  ;;  %5591 = vmatprep.subr.bf16.mxu1 %v6429_v11  ;;  %v6455_v32 = vld [vmem:[#allocation8 + $0x800] ss:$12 sps:$4 sm:$0xff]  }
 0x27c   :  { %4549 = vmatpush1.bf16.msra.mxu0 %v6401_v12  ;;  %4580 = vmatprep.mubr.bf16.mxu0 %v6842_v59  ;;  %v6416_v59 = vld [vmem:[#allocation8 + $0x664] ss:$12 sps:$4 sm:$0xff]   ;;  %v6461_v12 = vld [vmem:[#allocation8 + $0x768] ss:$12 sps:$4 sm:$0xff]  }
 0x27d   :  { %4831 = vmatmul.mubr.bf16.vlgmr.msra.gmra.mrb[32].mxu1 %v6840_v56  ;;  %4550 = vmatprep.subr.bf16.mxu0 %v6407_v52 }
 0x27e   :  { %5592 = vmatpush3.bf16.msra.mxu1 %v6430_v16 }
 0x27f   :  { %5593 = vmatprep.subr.bf16.mxu1 %v6434_v17  ;;  %v6466_v17 = vld [vmem:[#allocation8 + $0x780] ss:$12 sps:$4 sm:$0xff]  }
 0x280   :  { %4551 = vmatpush1.bf16.msra.mxu0 %v6405_v18  ;;  %v6471_v18 = vld [vmem:[#allocation8 + $0x79c] ss:$12 sps:$4 sm:$0xff]  }
 0x281   :  { %4552 = vmatprep.subr.bf16.mxu0 %v6410_v19  ;;  %v6469_v19 = vld [vmem:[#allocation8 + $0x798] ss:$12 sps:$4 sm:$0xff]  }
 0x282   :  { %5594 = vmatpush3.bf16.msra.mxu1 %v6435_v21  ;;  %v6474_v21 = vld [vmem:[#allocation8 + $0x7b4] ss:$12 sps:$4 sm:$0xff]  }
 0x283   :  { %5595 = vmatprep.subr.bf16.mxu1 %v6439_v22  ;;  %v6472_v22 = vld [vmem:[#allocation8 + $0x7b0] ss:$12 sps:$4 sm:$0xff]  }
 0x284   :  { %4553 = vmatpush1.bf16.msra.mxu0 %v6408_v23  ;;  %v6477_v23 = vld [vmem:[#allocation8 + $0x7cc] ss:$12 sps:$4 sm:$0xff]  }
 0x285   :  { %4554 = vmatprep.subr.bf16.mxu0 %v6413_v24  ;;  %v6475_v24 = vld [vmem:[#allocation8 + $0x7c8] ss:$12 sps:$4 sm:$0xff]  }
 0x286   :  { %5596 = vmatpush3.bf16.msra.mxu1 %v6440_v15  ;;  %v6480_v15 = vld [vmem:[#allocation8 + $0x7e4] ss:$12 sps:$4 sm:$0xff]  }
 0x287   :  { %5597 = vmatprep.subr.bf16.mxu1 %v6444_v61  ;;  %v6478_v61 = vld [vmem:[#allocation8 + $0x7e0] ss:$12 sps:$4 sm:$0xff]  }
 0x288   :  { %4555 = vmatpush1.bf16.msra.mxu0 %v6411_v25  ;;  %v6483_v25 = vld [vmem:[#allocation8 + $0x7fc] ss:$12 sps:$4 sm:$0xff]  }
 0x289   :  { %4556 = vmatprep.subr.bf16.mxu0 %v6416_v59  ;;  %v6486_v59 = vld [vmem:[#allocation8 + $0x814] ss:$12 sps:$4 sm:$0xff]  }
 0x28a   :  { %5598 = vmatpush3.bf16.msra.mxu1 %v6445_v60 }
 0x28b   :  { %5599 = vmatprep.subr.bf16.mxu1 %v6449_v3  ;;  %v6484_v3 = vld [vmem:[#allocation8 + $0x810] ss:$12 sps:$4 sm:$0xff]  }
 0x28c   :  { %4557 = vmatpush1.bf16.msra.mxu0 %v6414_v27 }
 0x28d   :  { %4558 = vmatprep.subr.bf16.mxu0 %v6419_v28  ;;  %v6489_v28 = vld [vmem:[#allocation8 + $0x82c] ss:$12 sps:$4 sm:$0xff]  }
 0x28e   :  { %5600 = vmatpush3.bf16.msra.mxu1 %v6450_v29 }
 0x28f   :  { %5601 = vmatprep.subr.bf16.mxu1 %v6454_v13 }
 0x290   :  { %4559 = vmatpush1.bf16.msra.mxu0 %v6417_v30 }
 0x291   :  { %4560 = vmatprep.subr.bf16.mxu0 %v6422_v31 }
 0x292   :  { %5602 = vmatpush3.bf16.msra.mxu1 %v6455_v32  ;;  %v6487_v32 = vld [vmem:[#allocation8 + $0x828] ss:$12 sps:$4 sm:$0xff]  }
 0x293   :  { %5603 = vmatprep.subr.bf16.mxu1 %v6459_v33  ;;  %v6492_v33 = vld [vmem:[#allocation8 + $0x844] ss:$12 sps:$4 sm:$0xff]  }
 0x294   :  { %4561 = vmatpush1.bf16.msra.mxu0 %v6420_v35  ;;  %v6490_v35 = vld [vmem:[#allocation8 + $0x840] ss:$12 sps:$4 sm:$0xff]  }
 0x295   :  { %4562 = vmatprep.subr.bf16.mxu0 %v6425_v36  ;;  %v6495_v36 = vld [vmem:[#allocation8 + $0x85c] ss:$12 sps:$4 sm:$0xff]  }
 0x296   :  { %5604 = vmatpush3.bf16.msra.mxu1 %v6460_v37  ;;  %v6493_v37 = vld [vmem:[#allocation8 + $0x858] ss:$12 sps:$4 sm:$0xff]  }
 0x297   :  { %5605 = vmatprep.subr.bf16.mxu1 %v6464_v38  ;;  %v6498_v38 = vld [vmem:[#allocation8 + $0x874] ss:$12 sps:$4 sm:$0xff]  }
 0x298   :  { %4563 = vmatpush1.bf16.msra.mxu0 %v6423_v39  ;;  %v6496_v39 = vld [vmem:[#allocation8 + $0x870] ss:$12 sps:$4 sm:$0xff]  }
 0x299   :  { %4564 = vmatprep.subr.bf16.mxu0 %v6428_v40  ;;  %v6501_v40 = vld [vmem:[#allocation8 + $0x88c] ss:$12 sps:$4 sm:$0xff]  }
 0x29a   :  { %5606 = vmatpush3.bf16.msra.mxu1 %v6465_v41  ;;  %v6499_v41 = vld [vmem:[#allocation8 + $0x888] ss:$12 sps:$4 sm:$0xff]  }
 0x29c   :  { %4565 = vmatpush1.bf16.msra.mxu0 %v6426_v42  ;;  %v6504_v42 = vld [vmem:[#allocation8 + $0x8a4] ss:$12 sps:$4 sm:$0xff]  }
 0x29d   :  { %4566 = vmatprep.subr.bf16.mxu0 %v6433_v43  ;;  %v6502_v43 = vld [vmem:[#allocation8 + $0x8a0] ss:$12 sps:$4 sm:$0xff]  }
 0x2a0   :  { %4567 = vmatpush1.bf16.msra.mxu0 %v6431_v44  ;;  %v6507_v44 = vld [vmem:[#allocation8 + $0x8bc] ss:$12 sps:$4 sm:$0xff]  }
 0x2a1   :  { %4568 = vmatprep.subr.bf16.mxu0 %v6438_v45  ;;  %v2823_v45 = vld [vmem:[#allocation10] sm:$0x7] }
 0x2a4   :  { %4569 = vmatpush1.bf16.msra.mxu0 %v6436_v46  ;;  %v6505_v46 = vld [vmem:[#allocation8 + $0x8b8] ss:$12 sps:$4 sm:$0xff]  }
 0x2a5   :  { %4570 = vmatprep.subr.bf16.mxu0 %v6443_v47  ;;  %v6510_v47 = vld [vmem:[#allocation8 + $0x8d4] ss:$12 sps:$4 sm:$0xff]  }
 0x2a8   :  { %4571 = vmatpush1.bf16.msra.mxu0 %v6441_v48  ;;  %v2836_v48 = vrot.slane %v2823_v45, %v6821_v51 }
 0x2a9   :  { %4572 = vmatprep.subr.bf16.mxu0 %v6448_v50 }
 0x2ac   :  { %4573 = vmatpush1.bf16.msra.mxu0 %v6446_v54  ;;  %v6508_v54 = vld [vmem:[#allocation8 + $0x8d0] ss:$12 sps:$4 sm:$0xff]  }
 0x2ad   :  { %4574 = vmatprep.subr.bf16.mxu0 %v6453_v14 }
 0x2b0   :  { %4575 = vmatpush1.bf16.msra.mxu0 %v6451_v55  ;;  %v2394_v63 = vpop.f32.mrb[12].mxu1  ;;  %v6513_v55 = vld [vmem:[#allocation8 + $0x8ec] ss:$12 sps:$4 sm:$0xff]  }
 0x2b1   :  { %v5633_v1 = vadd.f32 %v2394_v63, %v430_v58  ;;  %v2396_v2 = vpop.f32.mrb[13].mxu1  ;;  %4576 = vmatprep.subr.bf16.mxu0 %v6458_v62 }
 0x2b2   :  { %v5634_v5 = vadd.f32 %v2396_v2, %v434_v57  ;;  %v2398_v6 = vpop.f32.mrb[14].mxu1 }
 0x2b3   :  { %v2413_v7 = vmax.f32 %v5633_v1, 0.0  ;;  %v5635_v8 = vadd.f32 %v2398_v6, %v430_v58  ;;  %v2400_v9 = vpop.f32.mrb[15].mxu1 }
 0x2b4   :  { %v2414_v10 = vmax.f32 %v5634_v5, 0.0  ;;  %v5636_v11 = vadd.f32 %v2400_v9, %v434_v57  ;;  %4577 = vmatpush1.bf16.msra.mxu0 %v6456_v0 }
 0x2b5   :  { %v2425_v52 = vmax.f32 %v5635_v8, 0.0  ;;  %4578 = vmatprep.subr.bf16.mxu0 %v6463_v4  ;;  %v6511_v4 = vld [vmem:[#allocation8 + $0x8e8] ss:$12 sps:$4 sm:$0xff]  }
 0x2b6   :  { %v2426_v34 = vmax.f32 %v5636_v11, 0.0 }
 0x2b7   :  { %v6862_v26 = vpack.c.bf16 %v2425_v52, %v2413_v7 }
 0x2b8   :  { %v2438_v16 = vpack.c.bf16 %v2426_v34, %v2414_v10  ;;  %4579 = vmatpush1.bf16.msra.mxu0 %v6461_v12 }
 0x2b9   :  { %4591 = vmatprep.subr.bf16.mxu0 %v6468_v49 }
 0x2ba   :  { %4871 = vmatprep.mubr.bf16.mxu1 %v2438_v16 }
 0x2bb   :  { %4581 = vmatmul.mubr.bf16.vlgmr.msra.gmra.mrb[8].mxu0 %v6840_v56  ;;  %4872 = vmatmul.mubr.bf16.vlgmr.msra.gmra.mrb[36].mxu1 %v6862_v26  ;;  %v6481_v56 = vld [vmem:[#allocation8 + $0x7f8] ss:$12 sps:$4 sm:$0xff]  }
 0x2bc   :  { %4592 = vmatpush1.bf16.msra.mxu0 %v6466_v17  ;;  %4623 = vmatprep.mubr.bf16.mxu0 %v2438_v16 }
 0x2bd   :  { %4593 = vmatprep.subr.bf16.mxu0 %v6471_v18 }
 0x2c0   :  { %4594 = vmatpush1.bf16.msra.mxu0 %v6469_v19 }
 0x2c1   :  { %4595 = vmatprep.subr.bf16.mxu0 %v6474_v21 }
 0x2c4   :  { %4596 = vmatpush1.bf16.msra.mxu0 %v6472_v22 }
 0x2c5   :  { %4597 = vmatprep.subr.bf16.mxu0 %v6477_v23 }
 0x2c8   :  { %4598 = vmatpush1.bf16.msra.mxu0 %v6475_v24 }
 0x2c9   :  { %4599 = vmatprep.subr.bf16.mxu0 %v6480_v15 }
 0x2cc   :  { %4600 = vmatpush1.bf16.msra.mxu0 %v6478_v61 }
 0x2cd   :  { %4601 = vmatprep.subr.bf16.mxu0 %v6483_v25 }
 0x2d0   :  { %4602 = vmatpush1.bf16.msra.mxu0 %v6481_v56  ;;  %v5497_v60 = vpop.f32.mrb[16].mxu1 }
 0x2d1   :  { %v5498_v27 = vpop.f32.mrb[17].mxu1  ;;  %4603 = vmatprep.subr.bf16.mxu0 %v6486_v59 }
 0x2d2   :  { %v5499_v29 = vadd.f32 %v5498_v27, %v5497_v60  ;;  %v5500_v13 = vpop.f32.mrb[18].mxu1 }
 0x2d3   :  { %v5501_v30 = vpop.f32.mrb[19].mxu1 }
 0x2d4   :  { %4604 = vmatpush1.bf16.msra.mxu0 %v6484_v3  ;;  %v5502_v31 = vadd.f32 %v5501_v30, %v5500_v13  ;;  %v4669_v58 = vadd.f32 %v5499_v29, %v2836_v48 }
 0x2d5   :  { %4605 = vmatprep.subr.bf16.mxu0 %v6489_v28 }
 0x2d6   :  { %v4672_v0 = vadd.f32 %v5502_v31, %v2836_v48  ;;  %v2828_v31 = vrot.slane %v2823_v45, %v6793_v53 }
 0x2d8   :  { %4606 = vmatpush1.bf16.msra.mxu0 %v6487_v32  ;;  %v2832_v32 = vrot.slane %v2823_v45, %v6796_v20 }
 0x2d9   :  { %4607 = vmatprep.subr.bf16.mxu0 %v6492_v33 }
 0x2dc   :  { %4608 = vmatpush1.bf16.msra.mxu0 %v6490_v35 }
 0x2dd   :  { %4609 = vmatprep.subr.bf16.mxu0 %v6495_v36 }
 0x2e0   :  { %4610 = vmatpush1.bf16.msra.mxu0 %v6493_v37 }
 0x2e1   :  { %4611 = vmatprep.subr.bf16.mxu0 %v6498_v38 }
 0x2e4   :  { %4612 = vmatpush1.bf16.msra.mxu0 %v6496_v39 }
 0x2e5   :  { %4613 = vmatprep.subr.bf16.mxu0 %v6501_v40 }
 0x2e8   :  { %4614 = vmatpush1.bf16.msra.mxu0 %v6499_v41 }
 0x2e9   :  { %4615 = vmatprep.subr.bf16.mxu0 %v6504_v42 }
 0x2ec   :  { %4616 = vmatpush1.bf16.msra.mxu0 %v6502_v43 }
 0x2ed   :  { %4617 = vmatprep.subr.bf16.mxu0 %v6507_v44 }
 0x2f0   :  { %4618 = vmatpush1.bf16.msra.mxu0 %v6505_v46  ;;  %v5519_v50 = vpop.f32.mrb[20].mxu1 }
 0x2f1   :  { %v5520_v14 = vpop.f32.mrb[21].mxu1  ;;  %4619 = vmatprep.subr.bf16.mxu0 %v6510_v47 }
 0x2f2   :  { %v5521_v62 = vadd.f32 %v5520_v14, %v5519_v50  ;;  %v5522_v57 = vpop.f32.mrb[22].mxu1 }
 0x2f3   :  { %v5523_v63 = vpop.f32.mrb[23].mxu1 }
 0x2f4   :  { %v4710_v1 = vadd.f32 %v5521_v62, %v4669_v58  ;;  %4620 = vmatpush1.bf16.msra.mxu0 %v6508_v54  ;;  %v5524_v2 = vadd.f32 %v5523_v63, %v5522_v57 }
 0x2f5   :  { %4621 = vmatprep.subr.bf16.mxu0 %v6513_v55 }
 0x2f6   :  { %v4713_v5 = vadd.f32 %v5524_v2, %v4672_v0 }
 0x2f8   :  { %4622 = vmatpush1.bf16.msra.mxu0 %v6511_v4 }
 0x2fb   :  { %4624 = vmatmul.mubr.bf16.vlgmr.msra.gmra.mrb[8].mxu0 %v6862_v26 }
 0x310   :  { %v5541_v51 = vpop.f32.mrb[24].mxu1 }
 0x311   :  { %v5542_v6 = vpop.f32.mrb[25].mxu1 }
 0x312   :  { %v5543_v7 = vadd.f32 %v5542_v6, %v5541_v51  ;;  %v5544_v8 = vpop.f32.mrb[26].mxu1 }
 0x313   :  { %v5545_v9 = vpop.f32.mrb[27].mxu1 }
 0x314   :  { %v4751_v10 = vadd.f32 %v5543_v7, %v4710_v1  ;;  %v5546_v11 = vadd.f32 %v5545_v9, %v5544_v8 }
 0x316   :  { %v4754_v12 = vadd.f32 %v5546_v11, %v4713_v5 }
 0x330   :  { %v5563_v52 = vpop.f32.mrb[28].mxu1 }
 0x331   :  { %v5564_v49 = vpop.f32.mrb[29].mxu1 }
 0x332   :  { %v5565_v34 = vadd.f32 %v5564_v49, %v5563_v52  ;;  %v5566_v16 = vpop.f32.mrb[30].mxu1 }
 0x333   :  { %v5567_v17 = vpop.f32.mrb[31].mxu1 }
 0x334   :  { %v4792_v18 = vadd.f32 %v5565_v34, %v4751_v10  ;;  %v5568_v19 = vadd.f32 %v5567_v17, %v5566_v16 }
 0x336   :  { %v4795_v21 = vadd.f32 %v5568_v19, %v4754_v12 }
 0x350   :  { %v5585_v22 = vpop.f32.mrb[32].mxu1 }
 0x351   :  { %v5586_v23 = vpop.f32.mrb[33].mxu1 }
 0x352   :  { %v5587_v24 = vadd.f32 %v5586_v23, %v5585_v22  ;;  %v5588_v26 = vpop.f32.mrb[34].mxu1 }
 0x353   :  { %v5589_v15 = vpop.f32.mrb[35].mxu1 }
 0x354   :  { %v4833_v61 = vadd.f32 %v5587_v24, %v4792_v18  ;;  %v5590_v25 = vadd.f32 %v5589_v15, %v5588_v26 }
 0x356   :  { %v4836_v56 = vadd.f32 %v5590_v25, %v4795_v21 }
 0x38e   :  { %v5607_v59 = vpop.f32.mrb[36].mxu1 }
 0x38f   :  { %v5608_v60 = vpop.f32.mrb[37].mxu1 }
 0x390   :  { %v5609_v3 = vadd.f32 %v5608_v60, %v5607_v59  ;;  %v5610_v27 = vpop.f32.mrb[38].mxu1 }
 0x391   :  { %v5611_v28 = vpop.f32.mrb[39].mxu1 }
 0x392   :  { %v4874_v29 = vadd.f32 %v5609_v3, %v4833_v61  ;;  %v5612_v13 = vadd.f32 %v5611_v28, %v5610_v27 }
 0x394   :  { %4882 = vst [vmem:[#allocation11 + $0x10] sm:$0xff] %v4874_v29  ;;  %v4877_v30 = vadd.f32 %v5612_v13, %v4836_v56 }
 0x396   :  { %4885 = vst [vmem:[#allocation11 + $0x28] sm:$0xff] %v4877_v30 }
 0x3ce   :  { %v4625_v33 = vpop.f32.mrb[8].mxu0 }
 0x3cf   :  { %v5637_v35 = vadd.f32 %v4625_v33, %v2828_v31  ;;  %v4627_v36 = vpop.f32.mrb[9].mxu0 }
 0x3d0   :  { %v5638_v37 = vadd.f32 %v4627_v36, %v2832_v32  ;;  %v4629_v38 = vpop.f32.mrb[10].mxu0 }
 0x3d1   :  { %4880 = vst [vmem:[#allocation11] sm:$0xff] %v5637_v35  ;;  %v5639_v39 = vadd.f32 %v4629_v38, %v2828_v31  ;;  %v4631_v40 = vpop.f32.mrb[11].mxu0 }
 0x3d2   :  { %4881 = vst [vmem:[#allocation11 + $0x8] sm:$0xff] %v5638_v37  ;;  %v5640_v41 = vadd.f32 %v4631_v40, %v2832_v32 }
 0x3d3   :  { %4883 = vst [vmem:[#allocation11 + $0x18] sm:$0xff] %v5639_v39 }
 0x3d4   :  { %4884 = vst [vmem:[#allocation11 + $0x20] sm:$0xff] %v5640_v41 }
 0x3d5   :  { %6636 = shalt.err (!%p6633_p2)
}
 0x3d6   :  { %s6637_s10 = scalar_lea.hbm %s6890_s5, 768 }
 0x3d7   :  { %p6638_p3 = scmp.ne.s32.totalorder %s6890_s5, %s6637_s10  ;;  %p6641_p4 = scmp.lt.u32.totalorder %s6637_s10, %s6890_s5 }
 0x3d9   :  { %p6643_p5 = pnand %p6641_p4, %p6638_p3 }
 0x3db   :  { %6646 = shalt.err (!%p6643_p5)
}
 0x3dc   :  { %4897 = dma.vmem_to_hbm [thread:$0]  %s4892_s6, 768, %s6890_s5, [#allocation4], %s6662_s3, %s6662_s3, %s6663_s30  }
 0x3dd   :  { %6653 = dma.done.wait [#allocation4], 768  }
 0x3de   :  { %6654 = vsyncadd [#allocation4], 4294966528 }
 0x3df   :  { %4901 = vsyncpa [#allocation3], 1 }
 0x3e0   :  { %4902 = vsyncpa [#allocation6], 1 }
 0x3e1   :  { %4903 = vsyncpa [#allocation9], 1 }
 0x3e2   :  { %4904 = vsyncpa [#allocation4], 1 }

</bundles_post_ra>
